<compile_context>
chip_gen: v7x
topology: tpu7x:2x2x1
jax: 0.10.0
libtpu: 0.0.40
codegen_flags: <defaults>
</compile_context>

<pallas_src>
import functools
import math

import numpy as np
import jax
import jax.numpy as jnp
from jax import lax
from jax.experimental import pallas as pl
from jax.experimental.pallas import tpu as pltpu

# ----------------------------- config ---------------------------------------
VOCAB = 96
BLOCK_SIZE = 16
N_EMBD = 32
N_HEAD = 4
N_LAYER = 2
HEAD_DIM = N_EMBD // N_HEAD
FFN_DIM = 4 * N_EMBD
LN_EPS = 1e-5
NEG_INF = -1e30


# ------------------------------ kernel ---------------------------------------
def _ln(y, g, b):
    """LayerNorm over the last axis (biased variance, eps=1e-5), f32 math."""
    mean = jnp.mean(y, axis=-1, keepdims=True)
    var = jnp.mean((y - mean) ** 2, axis=-1, keepdims=True)
    return (y - mean) * lax.rsqrt(var + LN_EPS) * g + b


def _fused_gpt_kernel(
    ids_ref, pos_oh_ref, attn_bias_ref,
    tok_emb_ref, pos_emb_ref,
    in_w_ref, in_b_ref, out_w_ref, out_b_ref,
    ln1_g_ref, ln1_b_ref,
    lin1_w_ref, lin1_b_ref, lin2_w_ref, lin2_b_ref,
    ln2_g_ref, ln2_b_ref,
    lnf_g_ref, lnf_b_ref, head_w_ref, head_b_ref,
    o_ref,
):
    M = o_ref.shape[0]          # flattened tokens (= B*T), rows
    C = N_EMBD
    D = HEAD_DIM

    # ---- embeddings: exact gather via one-hot matmuls on resident tables ----
    ids = ids_ref[...]                                                   # (M,1) i32
    tok_oh = (ids == lax.broadcasted_iota(jnp.int32, (M, VOCAB), 1)
              ).astype(jnp.float32)                                      # (M,V)
    x = jnp.dot(tok_oh, tok_emb_ref[...], preferred_element_type=jnp.float32)
    x = x + jnp.dot(pos_oh_ref[...], pos_emb_ref[...],
                    preferred_element_type=jnp.float32)                  # (M,C)
    # dropout p=0 / eval -> identity

    attn_bias = attn_bias_ref[...]                                       # (M,M) f32
    scale = 1.0 / math.sqrt(D)
    qkt_dims = (((1,), (1,)), ((), ()))       # contract last dims -> q @ k^T

    for l in range(N_LAYER):
        w_qkv = in_w_ref[l].astype(jnp.bfloat16)     # (C, 3C)
        b_qkv = in_b_ref[l]                          # (1, 3C)
        w_out = out_w_ref[l].astype(jnp.bfloat16)    # (C, C)
        b_out = out_b_ref[l]                         # (1, C)
        w_ff1 = lin1_w_ref[l].astype(jnp.bfloat16)   # (C, 4C)
        b_ff1 = lin1_b_ref[l]                        # (1, 4C)
        w_ff2 = lin2_w_ref[l].astype(jnp.bfloat16)   # (4C, C)
        b_ff2 = lin2_b_ref[l]                        # (1, C)

        # --- self-attention block (post-LN) ---
        qkv = jnp.dot(x.astype(jnp.bfloat16), w_qkv,
                      preferred_element_type=jnp.float32) + b_qkv        # (M,3C)
        q = qkv[:, 0 * C:1 * C]
        k = qkv[:, 1 * C:2 * C]
        v = qkv[:, 2 * C:3 * C]

        heads = []
        for h in range(N_HEAD):
            sl = slice(h * D, (h + 1) * D)
            s = lax.dot_general(q[:, sl], k[:, sl], qkt_dims,
                                preferred_element_type=jnp.float32)      # (M,M)
            s = s * scale + attn_bias          # mask rows with t_i != t_j
            s = s - jnp.max(s, axis=-1, keepdims=True)
            p = jnp.exp(s)
            p = p * pl.reciprocal(jnp.sum(p, axis=-1, keepdims=True),
                                  approx=True)
            heads.append(jnp.dot(p, v[:, sl],
                                 preferred_element_type=jnp.float32))    # (M,D)
        attn = jnp.concatenate(heads, axis=-1)                           # (M,C)

        sa = jnp.dot(attn.astype(jnp.bfloat16), w_out,
                     preferred_element_type=jnp.float32) + b_out
        x = _ln(x + sa, ln1_g_ref[l], ln1_b_ref[l])

        # --- feed-forward block (erf GELU, post-LN) ---
        h1 = jnp.dot(x.astype(jnp.bfloat16), w_ff1,
                     preferred_element_type=jnp.float32) + b_ff1         # (M,4C)
        h1 = 0.5 * h1 * (1.0 + lax.erf(h1 * (1.0 / math.sqrt(2.0))))
        ff = jnp.dot(h1.astype(jnp.bfloat16), w_ff2,
                     preferred_element_type=jnp.float32) + b_ff2
        x = _ln(x + ff, ln2_g_ref[l], ln2_b_ref[l])

    # --- final LN + vocab head ---
    x = _ln(x, lnf_g_ref[...], lnf_b_ref[...])
    logits = jnp.dot(x.astype(jnp.bfloat16),
                     head_w_ref[...].astype(jnp.bfloat16),
                     preferred_element_type=jnp.float32) + head_b_ref[...]
    o_ref[...] = logits                                                   # (M,V)


# --------------------------- parameter init ----------------------------------
def init_params(key):
    """Weights stored pre-transposed in (K, N) layout, stacked over layers."""
    C, F, L = N_EMBD, FFN_DIM, N_LAYER

    def normal(k, shape):
        return 0.02 * jax.random.normal(k, shape, dtype=jnp.float32)

    keys = jax.random.split(key, 7)
    return {
        "tok_emb": normal(keys[0], (VOCAB, C)),
        "pos_emb": normal(keys[1], (BLOCK_SIZE, C)),
        "ln_f_g": jnp.ones((1, C), jnp.float32),
        "ln_f_b": jnp.zeros((1, C), jnp.float32),
        "head_w": normal(keys[2], (C, VOCAB)),            # (in, out) layout
        "head_b": jnp.zeros((1, VOCAB), jnp.float32),
        "layers": {
            "in_proj_w": normal(keys[3], (L, C, 3 * C)),
            "in_proj_b": jnp.zeros((L, 1, 3 * C), jnp.float32),
            "out_proj_w": normal(keys[4], (L, C, C)),
            "out_proj_b": jnp.zeros((L, 1, C), jnp.float32),
            "ln1_g": jnp.ones((L, 1, C), jnp.float32),
            "ln1_b": jnp.zeros((L, 1, C), jnp.float32),
            "lin1_w": normal(keys[5], (L, C, F)),
            "lin1_b": jnp.zeros((L, 1, F), jnp.float32),
            "lin2_w": normal(keys[6], (L, F, C)),
            "lin2_b": jnp.zeros((L, 1, C), jnp.float32),
            "ln2_g": jnp.ones((L, 1, C), jnp.float32),
            "ln2_b": jnp.zeros((L, 1, C), jnp.float32),
        },
    }


# ------------------------------ forward --------------------------------------
def _full_spec(shape):
    nd = len(shape)
    return pl.BlockSpec(shape, lambda: (0,) * nd)


@jax.jit
def gpt_forward(params, idx):
    B, T = idx.shape
    M = B * T

    ids = idx.reshape(M, 1).astype(jnp.int32)

    # Trace-time constants (depend only on static B, T).
    # Row r = b*T + t  ->  position t = r % T.
    t_of_row = np.arange(M) % T
    pos_oh = jnp.asarray(
        np.equal.outer(t_of_row, np.arange(BLOCK_SIZE)), dtype=jnp.float32)   # (M,BS)
    # batch_first=False: attention mixes across the B axis for each fixed t.
    attn_bias = jnp.asarray(
        np.where(np.equal.outer(t_of_row, t_of_row), 0.0, NEG_INF),
        dtype=jnp.float32)                                                    # (M,M)

    ly = params["layers"]
    inputs = [
        ids, pos_oh, attn_bias,
        params["tok_emb"], params["pos_emb"],
        ly["in_proj_w"], ly["in_proj_b"], ly["out_proj_w"], ly["out_proj_b"],
        ly["ln1_g"], ly["ln1_b"],
        ly["lin1_w"], ly["lin1_b"], ly["lin2_w"], ly["lin2_b"],
        ly["ln2_g"], ly["ln2_b"],
        params["ln_f_g"], params["ln_f_b"],
        params["head_w"], params["head_b"],
    ]

    logits = pl.pallas_call(
        _fused_gpt_kernel,
        out_shape=jax.ShapeDtypeStruct((M, VOCAB), jnp.float32),
        in_specs=[_full_spec(a.shape) for a in inputs],
        out_specs=_full_spec((M, VOCAB)),
        compiler_params=pltpu.CompilerParams(vmem_limit_bytes=32 * 1024 * 1024),
    )(*inputs)

    # targets=None in this synthetic run -> loss is None (cross-entropy skipped)
    return logits.reshape(B, T, VOCAB), None


# -------------------------------- main ----------------------------------------
if __name__ == "__main__":
    key = jax.random.PRNGKey(0)
    pkey, ikey = jax.random.split(key)
    params = init_params(pkey)

    B, T = 2, 8
    idx = jax.random.randint(ikey, (B, T), 0, VOCAB, dtype=jnp.int32)

    logits, loss = gpt_forward(params, idx)
    logits = jax.block_until_ready(logits)
    assert logits.shape == (B, T, VOCAB)
    assert logits.dtype == jnp.float32
    assert bool(jnp.all(jnp.isfinite(logits)))
    print("KERNEL_OK")
</pallas_src>

<mosaic_0001>
module attributes {stable_mosaic.version = 11 : i64} {
  func.func @_fused_gpt_kernel(%arg0: memref<16x1xi32, #tpu.memory_space<vmem>>, %arg1: memref<16x16xf32, #tpu.memory_space<vmem>>, %arg2: memref<16x16xf32, #tpu.memory_space<vmem>>, %arg3: memref<96x32xf32, #tpu.memory_space<vmem>>, %arg4: memref<16x32xf32, #tpu.memory_space<vmem>>, %arg5: memref<2x32x96xf32, #tpu.memory_space<vmem>>, %arg6: memref<2x1x96xf32, #tpu.memory_space<vmem>>, %arg7: memref<2x32x32xf32, #tpu.memory_space<vmem>>, %arg8: memref<2x1x32xf32, #tpu.memory_space<vmem>>, %arg9: memref<2x1x32xf32, #tpu.memory_space<vmem>>, %arg10: memref<2x1x32xf32, #tpu.memory_space<vmem>>, %arg11: memref<2x32x128xf32, #tpu.memory_space<vmem>>, %arg12: memref<2x1x128xf32, #tpu.memory_space<vmem>>, %arg13: memref<2x128x32xf32, #tpu.memory_space<vmem>>, %arg14: memref<2x1x32xf32, #tpu.memory_space<vmem>>, %arg15: memref<2x1x32xf32, #tpu.memory_space<vmem>>, %arg16: memref<2x1x32xf32, #tpu.memory_space<vmem>>, %arg17: memref<1x32xf32, #tpu.memory_space<vmem>>, %arg18: memref<1x32xf32, #tpu.memory_space<vmem>>, %arg19: memref<32x96xf32, #tpu.memory_space<vmem>>, %arg20: memref<1x96xf32, #tpu.memory_space<vmem>>, %arg21: memref<16x96xf32, #tpu.memory_space<vmem>>) attributes {dimension_semantics = [], scalar_prefetch = 0 : i64, scratch_operands = 0 : i64, tpu.core_type = #tpu.core_type<tc>} {
    %c0 = arith.constant 0 : index
    %c0_0 = arith.constant 0 : index
    %0 = vector.load %arg0[%c0, %c0_0] : memref<16x1xi32, #tpu.memory_space<vmem>>, vector<16x1xi32>
    %1 = tpu.iota {dimensions = array<i32: 1>} : vector<16x96xi32>
    %2 = vector.broadcast %0 : vector<16x1xi32> to vector<16x96xi32>
    %3 = arith.cmpi eq, %2, %1 : vector<16x96xi32>
    %4 = arith.extui %3 : vector<16x96xi1> to vector<16x96xi32>
    %5 = arith.sitofp %4 : vector<16x96xi32> to vector<16x96xf32>
    %c0_1 = arith.constant 0 : index
    %c0_2 = arith.constant 0 : index
    %6 = vector.load %arg3[%c0_1, %c0_2] : memref<96x32xf32, #tpu.memory_space<vmem>>, vector<96x32xf32>
    %cst = arith.constant dense<0.000000e+00> : vector<16x32xf32>
    %7 = tpu.matmul %5, %6, %cst {dimension_numbers = #tpu.dot_dimension_numbers<[1], [0], [0], [1], [0, 0, 1, 1], [], []>} : vector<16x96xf32>, vector<96x32xf32>, vector<16x32xf32> -> vector<16x32xf32>
    %c0_3 = arith.constant 0 : index
    %c0_4 = arith.constant 0 : index
    %8 = vector.load %arg1[%c0_3, %c0_4] : memref<16x16xf32, #tpu.memory_space<vmem>>, vector<16x16xf32>
    %c0_5 = arith.constant 0 : index
    %c0_6 = arith.constant 0 : index
    %9 = vector.load %arg4[%c0_5, %c0_6] : memref<16x32xf32, #tpu.memory_space<vmem>>, vector<16x32xf32>
    %cst_7 = arith.constant dense<0.000000e+00> : vector<16x32xf32>
    %10 = tpu.matmul %8, %9, %cst_7 {dimension_numbers = #tpu.dot_dimension_numbers<[1], [0], [0], [1], [0, 0, 1, 1], [], []>} : vector<16x16xf32>, vector<16x32xf32>, vector<16x32xf32> -> vector<16x32xf32>
    %11 = arith.addf %7, %10 : vector<16x32xf32>
    %c0_8 = arith.constant 0 : index
    %c0_9 = arith.constant 0 : index
    %12 = vector.load %arg2[%c0_8, %c0_9] : memref<16x16xf32, #tpu.memory_space<vmem>>, vector<16x16xf32>
    %c0_10 = arith.constant 0 : index
    %c0_11 = arith.constant 0 : index
    %c0_12 = arith.constant 0 : index
    %13 = vector.load %arg5[%c0_10, %c0_11, %c0_12] : memref<2x32x96xf32, #tpu.memory_space<vmem>>, vector<1x32x96xf32>
    %14 = vector.shape_cast %13 : vector<1x32x96xf32> to vector<32x96xf32>
    %15 = arith.truncf %14 : vector<32x96xf32> to vector<32x96xbf16>
    %c0_13 = arith.constant 0 : index
    %c0_14 = arith.constant 0 : index
    %c0_15 = arith.constant 0 : index
    %16 = vector.load %arg6[%c0_13, %c0_14, %c0_15] : memref<2x1x96xf32, #tpu.memory_space<vmem>>, vector<1x1x96xf32>
    %17 = vector.shape_cast %16 : vector<1x1x96xf32> to vector<1x96xf32>
    %c0_16 = arith.constant 0 : index
    %c0_17 = arith.constant 0 : index
    %c0_18 = arith.constant 0 : index
    %18 = vector.load %arg7[%c0_16, %c0_17, %c0_18] : memref<2x32x32xf32, #tpu.memory_space<vmem>>, vector<1x32x32xf32>
    %19 = vector.shape_cast %18 : vector<1x32x32xf32> to vector<32x32xf32>
    %20 = arith.truncf %19 : vector<32x32xf32> to vector<32x32xbf16>
    %c0_19 = arith.constant 0 : index
    %c0_20 = arith.constant 0 : index
    %c0_21 = arith.constant 0 : index
    %21 = vector.load %arg8[%c0_19, %c0_20, %c0_21] : memref<2x1x32xf32, #tpu.memory_space<vmem>>, vector<1x1x32xf32>
    %22 = vector.shape_cast %21 : vector<1x1x32xf32> to vector<1x32xf32>
    %c0_22 = arith.constant 0 : index
    %c0_23 = arith.constant 0 : index
    %c0_24 = arith.constant 0 : index
    %23 = vector.load %arg11[%c0_22, %c0_23, %c0_24] : memref<2x32x128xf32, #tpu.memory_space<vmem>>, vector<1x32x128xf32>
    %24 = vector.shape_cast %23 : vector<1x32x128xf32> to vector<32x128xf32>
    %25 = arith.truncf %24 : vector<32x128xf32> to vector<32x128xbf16>
    %c0_25 = arith.constant 0 : index
    %c0_26 = arith.constant 0 : index
    %c0_27 = arith.constant 0 : index
    %26 = vector.load %arg12[%c0_25, %c0_26, %c0_27] : memref<2x1x128xf32, #tpu.memory_space<vmem>>, vector<1x1x128xf32>
    %27 = vector.shape_cast %26 : vector<1x1x128xf32> to vector<1x128xf32>
    %c0_28 = arith.constant 0 : index
    %c0_29 = arith.constant 0 : index
    %c0_30 = arith.constant 0 : index
    %28 = vector.load %arg13[%c0_28, %c0_29, %c0_30] : memref<2x128x32xf32, #tpu.memory_space<vmem>>, vector<1x128x32xf32>
    %29 = vector.shape_cast %28 : vector<1x128x32xf32> to vector<128x32xf32>
    %30 = arith.truncf %29 : vector<128x32xf32> to vector<128x32xbf16>
    %c0_31 = arith.constant 0 : index
    %c0_32 = arith.constant 0 : index
    %c0_33 = arith.constant 0 : index
    %31 = vector.load %arg14[%c0_31, %c0_32, %c0_33] : memref<2x1x32xf32, #tpu.memory_space<vmem>>, vector<1x1x32xf32>
    %32 = vector.shape_cast %31 : vector<1x1x32xf32> to vector<1x32xf32>
    %33 = arith.truncf %11 : vector<16x32xf32> to vector<16x32xbf16>
    %cst_34 = arith.constant dense<0.000000e+00> : vector<16x96xf32>
    %34 = tpu.matmul %33, %15, %cst_34 {dimension_numbers = #tpu.dot_dimension_numbers<[1], [0], [0], [1], [0, 0, 1, 1], [], []>} : vector<16x32xbf16>, vector<32x96xbf16>, vector<16x96xf32> -> vector<16x96xf32>
    %35 = vector.broadcast %17 : vector<1x96xf32> to vector<16x96xf32>
    %36 = arith.addf %34, %35 : vector<16x96xf32>
    %37 = vector.extract_strided_slice %36 {offsets = [0, 0], sizes = [16, 32], strides = [1, 1]} : vector<16x96xf32> to vector<16x32xf32>
    %38 = vector.extract_strided_slice %36 {offsets = [0, 32], sizes = [16, 32], strides = [1, 1]} : vector<16x96xf32> to vector<16x32xf32>
    %39 = vector.extract_strided_slice %36 {offsets = [0, 64], sizes = [16, 32], strides = [1, 1]} : vector<16x96xf32> to vector<16x32xf32>
    %40 = vector.extract_strided_slice %37 {offsets = [0, 0], sizes = [16, 8], strides = [1, 1]} : vector<16x32xf32> to vector<16x8xf32>
    %41 = vector.extract_strided_slice %38 {offsets = [0, 0], sizes = [16, 8], strides = [1, 1]} : vector<16x32xf32> to vector<16x8xf32>
    %cst_35 = arith.constant dense<0.000000e+00> : vector<16x16xf32>
    %42 = tpu.matmul %40, %41, %cst_35 {dimension_numbers = #tpu.dot_dimension_numbers<[1], [1], [0], [0], [0, 0, 1, 0], [], []>} : vector<16x8xf32>, vector<16x8xf32>, vector<16x16xf32> -> vector<16x16xf32>
    %cst_36 = arith.constant 0.353553385 : f32
    %43 = vector.broadcast %cst_36 : f32 to vector<16x16xf32>
    %44 = arith.mulf %42, %43 : vector<16x16xf32>
    %45 = arith.addf %44, %12 : vector<16x16xf32>
    %cst_37 = arith.constant dense<0xFF800000> : vector<16xf32>
    %46 = vector.multi_reduction <maximumf>, %45, %cst_37 [1] : vector<16x16xf32> to vector<16xf32>
    %47 = vector.shape_cast %46 : vector<16xf32> to vector<16x1xf32>
    %48 = vector.broadcast %47 : vector<16x1xf32> to vector<16x16xf32>
    %49 = arith.subf %45, %48 : vector<16x16xf32>
    %50 = math.exp %49 : vector<16x16xf32>
    %cst_38 = arith.constant dense<0.000000e+00> : vector<16xf32>
    %51 = vector.multi_reduction <add>, %50, %cst_38 [1] : vector<16x16xf32> to vector<16xf32>
    %52 = vector.shape_cast %51 : vector<16xf32> to vector<16x1xf32>
    %53 = tpu.reciprocal %52 {approx = true} : vector<16x1xf32> -> vector<16x1xf32>
    %54 = vector.broadcast %53 : vector<16x1xf32> to vector<16x16xf32>
    %55 = arith.mulf %50, %54 : vector<16x16xf32>
    %56 = vector.extract_strided_slice %39 {offsets = [0, 0], sizes = [16, 8], strides = [1, 1]} : vector<16x32xf32> to vector<16x8xf32>
    %cst_39 = arith.constant dense<0.000000e+00> : vector<16x8xf32>
    %57 = tpu.matmul %55, %56, %cst_39 {dimension_numbers = #tpu.dot_dimension_numbers<[1], [0], [0], [1], [0, 0, 1, 1], [], []>} : vector<16x16xf32>, vector<16x8xf32>, vector<16x8xf32> -> vector<16x8xf32>
    %58 = vector.extract_strided_slice %37 {offsets = [0, 8], sizes = [16, 8], strides = [1, 1]} : vector<16x32xf32> to vector<16x8xf32>
    %59 = vector.extract_strided_slice %38 {offsets = [0, 8], sizes = [16, 8], strides = [1, 1]} : vector<16x32xf32> to vector<16x8xf32>
    %cst_40 = arith.constant dense<0.000000e+00> : vector<16x16xf32>
    %60 = tpu.matmul %58, %59, %cst_40 {dimension_numbers = #tpu.dot_dimension_numbers<[1], [1], [0], [0], [0, 0, 1, 0], [], []>} : vector<16x8xf32>, vector<16x8xf32>, vector<16x16xf32> -> vector<16x16xf32>
    %cst_41 = arith.constant 0.353553385 : f32
    %61 = vector.broadcast %cst_41 : f32 to vector<16x16xf32>
    %62 = arith.mulf %60, %61 : vector<16x16xf32>
    %63 = arith.addf %62, %12 : vector<16x16xf32>
    %cst_42 = arith.constant dense<0xFF800000> : vector<16xf32>
    %64 = vector.multi_reduction <maximumf>, %63, %cst_42 [1] : vector<16x16xf32> to vector<16xf32>
    %65 = vector.shape_cast %64 : vector<16xf32> to vector<16x1xf32>
    %66 = vector.broadcast %65 : vector<16x1xf32> to vector<16x16xf32>
    %67 = arith.subf %63, %66 : vector<16x16xf32>
    %68 = math.exp %67 : vector<16x16xf32>
    %cst_43 = arith.constant dense<0.000000e+00> : vector<16xf32>
    %69 = vector.multi_reduction <add>, %68, %cst_43 [1] : vector<16x16xf32> to vector<16xf32>
    %70 = vector.shape_cast %69 : vector<16xf32> to vector<16x1xf32>
    %71 = tpu.reciprocal %70 {approx = true} : vector<16x1xf32> -> vector<16x1xf32>
    %72 = vector.broadcast %71 : vector<16x1xf32> to vector<16x16xf32>
    %73 = arith.mulf %68, %72 : vector<16x16xf32>
    %74 = vector.extract_strided_slice %39 {offsets = [0, 8], sizes = [16, 8], strides = [1, 1]} : vector<16x32xf32> to vector<16x8xf32>
    %cst_44 = arith.constant dense<0.000000e+00> : vector<16x8xf32>
    %75 = tpu.matmul %73, %74, %cst_44 {dimension_numbers = #tpu.dot_dimension_numbers<[1], [0], [0], [1], [0, 0, 1, 1], [], []>} : vector<16x16xf32>, vector<16x8xf32>, vector<16x8xf32> -> vector<16x8xf32>
    %76 = vector.extract_strided_slice %37 {offsets = [0, 16], sizes = [16, 8], strides = [1, 1]} : vector<16x32xf32> to vector<16x8xf32>
    %77 = vector.extract_strided_slice %38 {offsets = [0, 16], sizes = [16, 8], strides = [1, 1]} : vector<16x32xf32> to vector<16x8xf32>
    %cst_45 = arith.constant dense<0.000000e+00> : vector<16x16xf32>
    %78 = tpu.matmul %76, %77, %cst_45 {dimension_numbers = #tpu.dot_dimension_numbers<[1], [1], [0], [0], [0, 0, 1, 0], [], []>} : vector<16x8xf32>, vector<16x8xf32>, vector<16x16xf32> -> vector<16x16xf32>
    %cst_46 = arith.constant 0.353553385 : f32
    %79 = vector.broadcast %cst_46 : f32 to vector<16x16xf32>
    %80 = arith.mulf %78, %79 : vector<16x16xf32>
    %81 = arith.addf %80, %12 : vector<16x16xf32>
    %cst_47 = arith.constant dense<0xFF800000> : vector<16xf32>
    %82 = vector.multi_reduction <maximumf>, %81, %cst_47 [1] : vector<16x16xf32> to vector<16xf32>
    %83 = vector.shape_cast %82 : vector<16xf32> to vector<16x1xf32>
    %84 = vector.broadcast %83 : vector<16x1xf32> to vector<16x16xf32>
    %85 = arith.subf %81, %84 : vector<16x16xf32>
    %86 = math.exp %85 : vector<16x16xf32>
    %cst_48 = arith.constant dense<0.000000e+00> : vector<16xf32>
    %87 = vector.multi_reduction <add>, %86, %cst_48 [1] : vector<16x16xf32> to vector<16xf32>
    %88 = vector.shape_cast %87 : vector<16xf32> to vector<16x1xf32>
    %89 = tpu.reciprocal %88 {approx = true} : vector<16x1xf32> -> vector<16x1xf32>
    %90 = vector.broadcast %89 : vector<16x1xf32> to vector<16x16xf32>
    %91 = arith.mulf %86, %90 : vector<16x16xf32>
    %92 = vector.extract_strided_slice %39 {offsets = [0, 16], sizes = [16, 8], strides = [1, 1]} : vector<16x32xf32> to vector<16x8xf32>
    %cst_49 = arith.constant dense<0.000000e+00> : vector<16x8xf32>
    %93 = tpu.matmul %91, %92, %cst_49 {dimension_numbers = #tpu.dot_dimension_numbers<[1], [0], [0], [1], [0, 0, 1, 1], [], []>} : vector<16x16xf32>, vector<16x8xf32>, vector<16x8xf32> -> vector<16x8xf32>
    %94 = vector.extract_strided_slice %37 {offsets = [0, 24], sizes = [16, 8], strides = [1, 1]} : vector<16x32xf32> to vector<16x8xf32>
    %95 = vector.extract_strided_slice %38 {offsets = [0, 24], sizes = [16, 8], strides = [1, 1]} : vector<16x32xf32> to vector<16x8xf32>
    %cst_50 = arith.constant dense<0.000000e+00> : vector<16x16xf32>
    %96 = tpu.matmul %94, %95, %cst_50 {dimension_numbers = #tpu.dot_dimension_numbers<[1], [1], [0], [0], [0, 0, 1, 0], [], []>} : vector<16x8xf32>, vector<16x8xf32>, vector<16x16xf32> -> vector<16x16xf32>
    %cst_51 = arith.constant 0.353553385 : f32
    %97 = vector.broadcast %cst_51 : f32 to vector<16x16xf32>
    %98 = arith.mulf %96, %97 : vector<16x16xf32>
    %99 = arith.addf %98, %12 : vector<16x16xf32>
    %cst_52 = arith.constant dense<0xFF800000> : vector<16xf32>
    %100 = vector.multi_reduction <maximumf>, %99, %cst_52 [1] : vector<16x16xf32> to vector<16xf32>
    %101 = vector.shape_cast %100 : vector<16xf32> to vector<16x1xf32>
    %102 = vector.broadcast %101 : vector<16x1xf32> to vector<16x16xf32>
    %103 = arith.subf %99, %102 : vector<16x16xf32>
    %104 = math.exp %103 : vector<16x16xf32>
    %cst_53 = arith.constant dense<0.000000e+00> : vector<16xf32>
    %105 = vector.multi_reduction <add>, %104, %cst_53 [1] : vector<16x16xf32> to vector<16xf32>
    %106 = vector.shape_cast %105 : vector<16xf32> to vector<16x1xf32>
    %107 = tpu.reciprocal %106 {approx = true} : vector<16x1xf32> -> vector<16x1xf32>
    %108 = vector.broadcast %107 : vector<16x1xf32> to vector<16x16xf32>
    %109 = arith.mulf %104, %108 : vector<16x16xf32>
    %110 = vector.extract_strided_slice %39 {offsets = [0, 24], sizes = [16, 8], strides = [1, 1]} : vector<16x32xf32> to vector<16x8xf32>
    %cst_54 = arith.constant dense<0.000000e+00> : vector<16x8xf32>
    %111 = tpu.matmul %109, %110, %cst_54 {dimension_numbers = #tpu.dot_dimension_numbers<[1], [0], [0], [1], [0, 0, 1, 1], [], []>} : vector<16x16xf32>, vector<16x8xf32>, vector<16x8xf32> -> vector<16x8xf32>
    %112 = tpu.concatenate %57, %75, %93, %111 in 1 : vector<16x8xf32>, vector<16x8xf32>, vector<16x8xf32>, vector<16x8xf32> -> vector<16x32xf32>
    %113 = arith.truncf %112 : vector<16x32xf32> to vector<16x32xbf16>
    %cst_55 = arith.constant dense<0.000000e+00> : vector<16x32xf32>
    %114 = tpu.matmul %113, %20, %cst_55 {dimension_numbers = #tpu.dot_dimension_numbers<[1], [0], [0], [1], [0, 0, 1, 1], [], []>} : vector<16x32xbf16>, vector<32x32xbf16>, vector<16x32xf32> -> vector<16x32xf32>
    %115 = vector.broadcast %22 : vector<1x32xf32> to vector<16x32xf32>
    %116 = arith.addf %114, %115 : vector<16x32xf32>
    %117 = arith.addf %11, %116 : vector<16x32xf32>
    %c0_56 = arith.constant 0 : index
    %c0_57 = arith.constant 0 : index
    %c0_58 = arith.constant 0 : index
    %118 = vector.load %arg9[%c0_56, %c0_57, %c0_58] : memref<2x1x32xf32, #tpu.memory_space<vmem>>, vector<1x1x32xf32>
    %119 = vector.shape_cast %118 : vector<1x1x32xf32> to vector<1x32xf32>
    %c0_59 = arith.constant 0 : index
    %c0_60 = arith.constant 0 : index
    %c0_61 = arith.constant 0 : index
    %120 = vector.load %arg10[%c0_59, %c0_60, %c0_61] : memref<2x1x32xf32, #tpu.memory_space<vmem>>, vector<1x1x32xf32>
    %121 = vector.shape_cast %120 : vector<1x1x32xf32> to vector<1x32xf32>
    %cst_62 = arith.constant dense<0.000000e+00> : vector<16xf32>
    %122 = vector.multi_reduction <add>, %117, %cst_62 [1] : vector<16x32xf32> to vector<16xf32>
    %123 = vector.shape_cast %122 : vector<16xf32> to vector<16x1xf32>
    %cst_63 = arith.constant 3.200000e+01 : f32
    %124 = vector.broadcast %cst_63 : f32 to vector<16x1xf32>
    %125 = arith.divf %123, %124 : vector<16x1xf32>
    %126 = vector.broadcast %125 : vector<16x1xf32> to vector<16x32xf32>
    %127 = arith.subf %117, %126 : vector<16x32xf32>
    %128 = arith.mulf %127, %127 : vector<16x32xf32>
    %cst_64 = arith.constant dense<0.000000e+00> : vector<16xf32>
    %129 = vector.multi_reduction <add>, %128, %cst_64 [1] : vector<16x32xf32> to vector<16xf32>
    %130 = vector.shape_cast %129 : vector<16xf32> to vector<16x1xf32>
    %cst_65 = arith.constant 3.200000e+01 : f32
    %131 = vector.broadcast %cst_65 : f32 to vector<16x1xf32>
    %132 = arith.divf %130, %131 : vector<16x1xf32>
    %133 = vector.broadcast %125 : vector<16x1xf32> to vector<16x32xf32>
    %134 = arith.subf %117, %133 : vector<16x32xf32>
    %cst_66 = arith.constant 9.99999974E-6 : f32
    %135 = vector.broadcast %cst_66 : f32 to vector<16x1xf32>
    %136 = arith.addf %132, %135 : vector<16x1xf32>
    %137 = math.rsqrt %136 : vector<16x1xf32>
    %138 = vector.broadcast %137 : vector<16x1xf32> to vector<16x32xf32>
    %139 = arith.mulf %134, %138 : vector<16x32xf32>
    %140 = vector.broadcast %119 : vector<1x32xf32> to vector<16x32xf32>
    %141 = arith.mulf %139, %140 : vector<16x32xf32>
    %142 = vector.broadcast %121 : vector<1x32xf32> to vector<16x32xf32>
    %143 = arith.addf %141, %142 : vector<16x32xf32>
    %144 = arith.truncf %143 : vector<16x32xf32> to vector<16x32xbf16>
    %cst_67 = arith.constant dense<0.000000e+00> : vector<16x128xf32>
    %145 = tpu.matmul %144, %25, %cst_67 {dimension_numbers = #tpu.dot_dimension_numbers<[1], [0], [0], [1], [0, 0, 1, 1], [], []>} : vector<16x32xbf16>, vector<32x128xbf16>, vector<16x128xf32> -> vector<16x128xf32>
    %146 = vector.broadcast %27 : vector<1x128xf32> to vector<16x128xf32>
    %147 = arith.addf %145, %146 : vector<16x128xf32>
    %cst_68 = arith.constant 5.000000e-01 : f32
    %148 = vector.broadcast %cst_68 : f32 to vector<16x128xf32>
    %149 = arith.mulf %148, %147 : vector<16x128xf32>
    %cst_69 = arith.constant 0.707106769 : f32
    %150 = vector.broadcast %cst_69 : f32 to vector<16x128xf32>
    %151 = arith.mulf %147, %150 : vector<16x128xf32>
    %152 = math.erf %151 : vector<16x128xf32>
    %cst_70 = arith.constant 1.000000e+00 : f32
    %153 = vector.broadcast %cst_70 : f32 to vector<16x128xf32>
    %154 = arith.addf %153, %152 : vector<16x128xf32>
    %155 = arith.mulf %149, %154 : vector<16x128xf32>
    %156 = arith.truncf %155 : vector<16x128xf32> to vector<16x128xbf16>
    %cst_71 = arith.constant dense<0.000000e+00> : vector<16x32xf32>
    %157 = tpu.matmul %156, %30, %cst_71 {dimension_numbers = #tpu.dot_dimension_numbers<[1], [0], [0], [1], [0, 0, 1, 1], [], []>} : vector<16x128xbf16>, vector<128x32xbf16>, vector<16x32xf32> -> vector<16x32xf32>
    %158 = vector.broadcast %32 : vector<1x32xf32> to vector<16x32xf32>
    %159 = arith.addf %157, %158 : vector<16x32xf32>
    %160 = arith.addf %143, %159 : vector<16x32xf32>
    %c0_72 = arith.constant 0 : index
    %c0_73 = arith.constant 0 : index
    %c0_74 = arith.constant 0 : index
    %161 = vector.load %arg15[%c0_72, %c0_73, %c0_74] : memref<2x1x32xf32, #tpu.memory_space<vmem>>, vector<1x1x32xf32>
    %162 = vector.shape_cast %161 : vector<1x1x32xf32> to vector<1x32xf32>
    %c0_75 = arith.constant 0 : index
    %c0_76 = arith.constant 0 : index
    %c0_77 = arith.constant 0 : index
    %163 = vector.load %arg16[%c0_75, %c0_76, %c0_77] : memref<2x1x32xf32, #tpu.memory_space<vmem>>, vector<1x1x32xf32>
    %164 = vector.shape_cast %163 : vector<1x1x32xf32> to vector<1x32xf32>
    %cst_78 = arith.constant dense<0.000000e+00> : vector<16xf32>
    %165 = vector.multi_reduction <add>, %160, %cst_78 [1] : vector<16x32xf32> to vector<16xf32>
    %166 = vector.shape_cast %165 : vector<16xf32> to vector<16x1xf32>
    %cst_79 = arith.constant 3.200000e+01 : f32
    %167 = vector.broadcast %cst_79 : f32 to vector<16x1xf32>
    %168 = arith.divf %166, %167 : vector<16x1xf32>
    %169 = vector.broadcast %168 : vector<16x1xf32> to vector<16x32xf32>
    %170 = arith.subf %160, %169 : vector<16x32xf32>
    %171 = arith.mulf %170, %170 : vector<16x32xf32>
    %cst_80 = arith.constant dense<0.000000e+00> : vector<16xf32>
    %172 = vector.multi_reduction <add>, %171, %cst_80 [1] : vector<16x32xf32> to vector<16xf32>
    %173 = vector.shape_cast %172 : vector<16xf32> to vector<16x1xf32>
    %cst_81 = arith.constant 3.200000e+01 : f32
    %174 = vector.broadcast %cst_81 : f32 to vector<16x1xf32>
    %175 = arith.divf %173, %174 : vector<16x1xf32>
    %176 = vector.broadcast %168 : vector<16x1xf32> to vector<16x32xf32>
    %177 = arith.subf %160, %176 : vector<16x32xf32>
    %cst_82 = arith.constant 9.99999974E-6 : f32
    %178 = vector.broadcast %cst_82 : f32 to vector<16x1xf32>
    %179 = arith.addf %175, %178 : vector<16x1xf32>
    %180 = math.rsqrt %179 : vector<16x1xf32>
    %181 = vector.broadcast %180 : vector<16x1xf32> to vector<16x32xf32>
    %182 = arith.mulf %177, %181 : vector<16x32xf32>
    %183 = vector.broadcast %162 : vector<1x32xf32> to vector<16x32xf32>
    %184 = arith.mulf %182, %183 : vector<16x32xf32>
    %185 = vector.broadcast %164 : vector<1x32xf32> to vector<16x32xf32>
    %186 = arith.addf %184, %185 : vector<16x32xf32>
    %c1 = arith.constant 1 : index
    %c0_83 = arith.constant 0 : index
    %c0_84 = arith.constant 0 : index
    %187 = vector.load %arg5[%c1, %c0_83, %c0_84] : memref<2x32x96xf32, #tpu.memory_space<vmem>>, vector<1x32x96xf32>
    %188 = vector.shape_cast %187 : vector<1x32x96xf32> to vector<32x96xf32>
    %189 = arith.truncf %188 : vector<32x96xf32> to vector<32x96xbf16>
    %c1_85 = arith.constant 1 : index
    %c0_86 = arith.constant 0 : index
    %c0_87 = arith.constant 0 : index
    %190 = vector.load %arg6[%c1_85, %c0_86, %c0_87] : memref<2x1x96xf32, #tpu.memory_space<vmem>>, vector<1x1x96xf32>
    %191 = vector.shape_cast %190 : vector<1x1x96xf32> to vector<1x96xf32>
    %c1_88 = arith.constant 1 : index
    %c0_89 = arith.constant 0 : index
    %c0_90 = arith.constant 0 : index
    %192 = vector.load %arg7[%c1_88, %c0_89, %c0_90] : memref<2x32x32xf32, #tpu.memory_space<vmem>>, vector<1x32x32xf32>
    %193 = vector.shape_cast %192 : vector<1x32x32xf32> to vector<32x32xf32>
    %194 = arith.truncf %193 : vector<32x32xf32> to vector<32x32xbf16>
    %c1_91 = arith.constant 1 : index
    %c0_92 = arith.constant 0 : index
    %c0_93 = arith.constant 0 : index
    %195 = vector.load %arg8[%c1_91, %c0_92, %c0_93] : memref<2x1x32xf32, #tpu.memory_space<vmem>>, vector<1x1x32xf32>
    %196 = vector.shape_cast %195 : vector<1x1x32xf32> to vector<1x32xf32>
    %c1_94 = arith.constant 1 : index
    %c0_95 = arith.constant 0 : index
    %c0_96 = arith.constant 0 : index
    %197 = vector.load %arg11[%c1_94, %c0_95, %c0_96] : memref<2x32x128xf32, #tpu.memory_space<vmem>>, vector<1x32x128xf32>
    %198 = vector.shape_cast %197 : vector<1x32x128xf32> to vector<32x128xf32>
    %199 = arith.truncf %198 : vector<32x128xf32> to vector<32x128xbf16>
    %c1_97 = arith.constant 1 : index
    %c0_98 = arith.constant 0 : index
    %c0_99 = arith.constant 0 : index
    %200 = vector.load %arg12[%c1_97, %c0_98, %c0_99] : memref<2x1x128xf32, #tpu.memory_space<vmem>>, vector<1x1x128xf32>
    %201 = vector.shape_cast %200 : vector<1x1x128xf32> to vector<1x128xf32>
    %c1_100 = arith.constant 1 : index
    %c0_101 = arith.constant 0 : index
    %c0_102 = arith.constant 0 : index
    %202 = vector.load %arg13[%c1_100, %c0_101, %c0_102] : memref<2x128x32xf32, #tpu.memory_space<vmem>>, vector<1x128x32xf32>
    %203 = vector.shape_cast %202 : vector<1x128x32xf32> to vector<128x32xf32>
    %204 = arith.truncf %203 : vector<128x32xf32> to vector<128x32xbf16>
    %c1_103 = arith.constant 1 : index
    %c0_104 = arith.constant 0 : index
    %c0_105 = arith.constant 0 : index
    %205 = vector.load %arg14[%c1_103, %c0_104, %c0_105] : memref<2x1x32xf32, #tpu.memory_space<vmem>>, vector<1x1x32xf32>
    %206 = vector.shape_cast %205 : vector<1x1x32xf32> to vector<1x32xf32>
    %207 = arith.truncf %186 : vector<16x32xf32> to vector<16x32xbf16>
    %cst_106 = arith.constant dense<0.000000e+00> : vector<16x96xf32>
    %208 = tpu.matmul %207, %189, %cst_106 {dimension_numbers = #tpu.dot_dimension_numbers<[1], [0], [0], [1], [0, 0, 1, 1], [], []>} : vector<16x32xbf16>, vector<32x96xbf16>, vector<16x96xf32> -> vector<16x96xf32>
    %209 = vector.broadcast %191 : vector<1x96xf32> to vector<16x96xf32>
    %210 = arith.addf %208, %209 : vector<16x96xf32>
    %211 = vector.extract_strided_slice %210 {offsets = [0, 0], sizes = [16, 32], strides = [1, 1]} : vector<16x96xf32> to vector<16x32xf32>
    %212 = vector.extract_strided_slice %210 {offsets = [0, 32], sizes = [16, 32], strides = [1, 1]} : vector<16x96xf32> to vector<16x32xf32>
    %213 = vector.extract_strided_slice %210 {offsets = [0, 64], sizes = [16, 32], strides = [1, 1]} : vector<16x96xf32> to vector<16x32xf32>
    %214 = vector.extract_strided_slice %211 {offsets = [0, 0], sizes = [16, 8], strides = [1, 1]} : vector<16x32xf32> to vector<16x8xf32>
    %215 = vector.extract_strided_slice %212 {offsets = [0, 0], sizes = [16, 8], strides = [1, 1]} : vector<16x32xf32> to vector<16x8xf32>
    %cst_107 = arith.constant dense<0.000000e+00> : vector<16x16xf32>
    %216 = tpu.matmul %214, %215, %cst_107 {dimension_numbers = #tpu.dot_dimension_numbers<[1], [1], [0], [0], [0, 0, 1, 0], [], []>} : vector<16x8xf32>, vector<16x8xf32>, vector<16x16xf32> -> vector<16x16xf32>
    %cst_108 = arith.constant 0.353553385 : f32
    %217 = vector.broadcast %cst_108 : f32 to vector<16x16xf32>
    %218 = arith.mulf %216, %217 : vector<16x16xf32>
    %219 = arith.addf %218, %12 : vector<16x16xf32>
    %cst_109 = arith.constant dense<0xFF800000> : vector<16xf32>
    %220 = vector.multi_reduction <maximumf>, %219, %cst_109 [1] : vector<16x16xf32> to vector<16xf32>
    %221 = vector.shape_cast %220 : vector<16xf32> to vector<16x1xf32>
    %222 = vector.broadcast %221 : vector<16x1xf32> to vector<16x16xf32>
    %223 = arith.subf %219, %222 : vector<16x16xf32>
    %224 = math.exp %223 : vector<16x16xf32>
    %cst_110 = arith.constant dense<0.000000e+00> : vector<16xf32>
    %225 = vector.multi_reduction <add>, %224, %cst_110 [1] : vector<16x16xf32> to vector<16xf32>
    %226 = vector.shape_cast %225 : vector<16xf32> to vector<16x1xf32>
    %227 = tpu.reciprocal %226 {approx = true} : vector<16x1xf32> -> vector<16x1xf32>
    %228 = vector.broadcast %227 : vector<16x1xf32> to vector<16x16xf32>
    %229 = arith.mulf %224, %228 : vector<16x16xf32>
    %230 = vector.extract_strided_slice %213 {offsets = [0, 0], sizes = [16, 8], strides = [1, 1]} : vector<16x32xf32> to vector<16x8xf32>
    %cst_111 = arith.constant dense<0.000000e+00> : vector<16x8xf32>
    %231 = tpu.matmul %229, %230, %cst_111 {dimension_numbers = #tpu.dot_dimension_numbers<[1], [0], [0], [1], [0, 0, 1, 1], [], []>} : vector<16x16xf32>, vector<16x8xf32>, vector<16x8xf32> -> vector<16x8xf32>
    %232 = vector.extract_strided_slice %211 {offsets = [0, 8], sizes = [16, 8], strides = [1, 1]} : vector<16x32xf32> to vector<16x8xf32>
    %233 = vector.extract_strided_slice %212 {offsets = [0, 8], sizes = [16, 8], strides = [1, 1]} : vector<16x32xf32> to vector<16x8xf32>
    %cst_112 = arith.constant dense<0.000000e+00> : vector<16x16xf32>
    %234 = tpu.matmul %232, %233, %cst_112 {dimension_numbers = #tpu.dot_dimension_numbers<[1], [1], [0], [0], [0, 0, 1, 0], [], []>} : vector<16x8xf32>, vector<16x8xf32>, vector<16x16xf32> -> vector<16x16xf32>
    %cst_113 = arith.constant 0.353553385 : f32
    %235 = vector.broadcast %cst_113 : f32 to vector<16x16xf32>
    %236 = arith.mulf %234, %235 : vector<16x16xf32>
    %237 = arith.addf %236, %12 : vector<16x16xf32>
    %cst_114 = arith.constant dense<0xFF800000> : vector<16xf32>
    %238 = vector.multi_reduction <maximumf>, %237, %cst_114 [1] : vector<16x16xf32> to vector<16xf32>
    %239 = vector.shape_cast %238 : vector<16xf32> to vector<16x1xf32>
    %240 = vector.broadcast %239 : vector<16x1xf32> to vector<16x16xf32>
    %241 = arith.subf %237, %240 : vector<16x16xf32>
    %242 = math.exp %241 : vector<16x16xf32>
    %cst_115 = arith.constant dense<0.000000e+00> : vector<16xf32>
    %243 = vector.multi_reduction <add>, %242, %cst_115 [1] : vector<16x16xf32> to vector<16xf32>
    %244 = vector.shape_cast %243 : vector<16xf32> to vector<16x1xf32>
    %245 = tpu.reciprocal %244 {approx = true} : vector<16x1xf32> -> vector<16x1xf32>
    %246 = vector.broadcast %245 : vector<16x1xf32> to vector<16x16xf32>
    %247 = arith.mulf %242, %246 : vector<16x16xf32>
    %248 = vector.extract_strided_slice %213 {offsets = [0, 8], sizes = [16, 8], strides = [1, 1]} : vector<16x32xf32> to vector<16x8xf32>
    %cst_116 = arith.constant dense<0.000000e+00> : vector<16x8xf32>
    %249 = tpu.matmul %247, %248, %cst_116 {dimension_numbers = #tpu.dot_dimension_numbers<[1], [0], [0], [1], [0, 0, 1, 1], [], []>} : vector<16x16xf32>, vector<16x8xf32>, vector<16x8xf32> -> vector<16x8xf32>
    %250 = vector.extract_strided_slice %211 {offsets = [0, 16], sizes = [16, 8], strides = [1, 1]} : vector<16x32xf32> to vector<16x8xf32>
    %251 = vector.extract_strided_slice %212 {offsets = [0, 16], sizes = [16, 8], strides = [1, 1]} : vector<16x32xf32> to vector<16x8xf32>
    %cst_117 = arith.constant dense<0.000000e+00> : vector<16x16xf32>
    %252 = tpu.matmul %250, %251, %cst_117 {dimension_numbers = #tpu.dot_dimension_numbers<[1], [1], [0], [0], [0, 0, 1, 0], [], []>} : vector<16x8xf32>, vector<16x8xf32>, vector<16x16xf32> -> vector<16x16xf32>
    %cst_118 = arith.constant 0.353553385 : f32
    %253 = vector.broadcast %cst_118 : f32 to vector<16x16xf32>
    %254 = arith.mulf %252, %253 : vector<16x16xf32>
    %255 = arith.addf %254, %12 : vector<16x16xf32>
    %cst_119 = arith.constant dense<0xFF800000> : vector<16xf32>
    %256 = vector.multi_reduction <maximumf>, %255, %cst_119 [1] : vector<16x16xf32> to vector<16xf32>
    %257 = vector.shape_cast %256 : vector<16xf32> to vector<16x1xf32>
    %258 = vector.broadcast %257 : vector<16x1xf32> to vector<16x16xf32>
    %259 = arith.subf %255, %258 : vector<16x16xf32>
    %260 = math.exp %259 : vector<16x16xf32>
    %cst_120 = arith.constant dense<0.000000e+00> : vector<16xf32>
    %261 = vector.multi_reduction <add>, %260, %cst_120 [1] : vector<16x16xf32> to vector<16xf32>
    %262 = vector.shape_cast %261 : vector<16xf32> to vector<16x1xf32>
    %263 = tpu.reciprocal %262 {approx = true} : vector<16x1xf32> -> vector<16x1xf32>
    %264 = vector.broadcast %263 : vector<16x1xf32> to vector<16x16xf32>
    %265 = arith.mulf %260, %264 : vector<16x16xf32>
    %266 = vector.extract_strided_slice %213 {offsets = [0, 16], sizes = [16, 8], strides = [1, 1]} : vector<16x32xf32> to vector<16x8xf32>
    %cst_121 = arith.constant dense<0.000000e+00> : vector<16x8xf32>
    %267 = tpu.matmul %265, %266, %cst_121 {dimension_numbers = #tpu.dot_dimension_numbers<[1], [0], [0], [1], [0, 0, 1, 1], [], []>} : vector<16x16xf32>, vector<16x8xf32>, vector<16x8xf32> -> vector<16x8xf32>
    %268 = vector.extract_strided_slice %211 {offsets = [0, 24], sizes = [16, 8], strides = [1, 1]} : vector<16x32xf32> to vector<16x8xf32>
    %269 = vector.extract_strided_slice %212 {offsets = [0, 24], sizes = [16, 8], strides = [1, 1]} : vector<16x32xf32> to vector<16x8xf32>
    %cst_122 = arith.constant dense<0.000000e+00> : vector<16x16xf32>
    %270 = tpu.matmul %268, %269, %cst_122 {dimension_numbers = #tpu.dot_dimension_numbers<[1], [1], [0], [0], [0, 0, 1, 0], [], []>} : vector<16x8xf32>, vector<16x8xf32>, vector<16x16xf32> -> vector<16x16xf32>
    %cst_123 = arith.constant 0.353553385 : f32
    %271 = vector.broadcast %cst_123 : f32 to vector<16x16xf32>
    %272 = arith.mulf %270, %271 : vector<16x16xf32>
    %273 = arith.addf %272, %12 : vector<16x16xf32>
    %cst_124 = arith.constant dense<0xFF800000> : vector<16xf32>
    %274 = vector.multi_reduction <maximumf>, %273, %cst_124 [1] : vector<16x16xf32> to vector<16xf32>
    %275 = vector.shape_cast %274 : vector<16xf32> to vector<16x1xf32>
    %276 = vector.broadcast %275 : vector<16x1xf32> to vector<16x16xf32>
    %277 = arith.subf %273, %276 : vector<16x16xf32>
    %278 = math.exp %277 : vector<16x16xf32>
    %cst_125 = arith.constant dense<0.000000e+00> : vector<16xf32>
    %279 = vector.multi_reduction <add>, %278, %cst_125 [1] : vector<16x16xf32> to vector<16xf32>
    %280 = vector.shape_cast %279 : vector<16xf32> to vector<16x1xf32>
    %281 = tpu.reciprocal %280 {approx = true} : vector<16x1xf32> -> vector<16x1xf32>
    %282 = vector.broadcast %281 : vector<16x1xf32> to vector<16x16xf32>
    %283 = arith.mulf %278, %282 : vector<16x16xf32>
    %284 = vector.extract_strided_slice %213 {offsets = [0, 24], sizes = [16, 8], strides = [1, 1]} : vector<16x32xf32> to vector<16x8xf32>
    %cst_126 = arith.constant dense<0.000000e+00> : vector<16x8xf32>
    %285 = tpu.matmul %283, %284, %cst_126 {dimension_numbers = #tpu.dot_dimension_numbers<[1], [0], [0], [1], [0, 0, 1, 1], [], []>} : vector<16x16xf32>, vector<16x8xf32>, vector<16x8xf32> -> vector<16x8xf32>
    %286 = tpu.concatenate %231, %249, %267, %285 in 1 : vector<16x8xf32>, vector<16x8xf32>, vector<16x8xf32>, vector<16x8xf32> -> vector<16x32xf32>
    %287 = arith.truncf %286 : vector<16x32xf32> to vector<16x32xbf16>
    %cst_127 = arith.constant dense<0.000000e+00> : vector<16x32xf32>
    %288 = tpu.matmul %287, %194, %cst_127 {dimension_numbers = #tpu.dot_dimension_numbers<[1], [0], [0], [1], [0, 0, 1, 1], [], []>} : vector<16x32xbf16>, vector<32x32xbf16>, vector<16x32xf32> -> vector<16x32xf32>
    %289 = vector.broadcast %196 : vector<1x32xf32> to vector<16x32xf32>
    %290 = arith.addf %288, %289 : vector<16x32xf32>
    %291 = arith.addf %186, %290 : vector<16x32xf32>
    %c1_128 = arith.constant 1 : index
    %c0_129 = arith.constant 0 : index
    %c0_130 = arith.constant 0 : index
    %292 = vector.load %arg9[%c1_128, %c0_129, %c0_130] : memref<2x1x32xf32, #tpu.memory_space<vmem>>, vector<1x1x32xf32>
    %293 = vector.shape_cast %292 : vector<1x1x32xf32> to vector<1x32xf32>
    %c1_131 = arith.constant 1 : index
    %c0_132 = arith.constant 0 : index
    %c0_133 = arith.constant 0 : index
    %294 = vector.load %arg10[%c1_131, %c0_132, %c0_133] : memref<2x1x32xf32, #tpu.memory_space<vmem>>, vector<1x1x32xf32>
    %295 = vector.shape_cast %294 : vector<1x1x32xf32> to vector<1x32xf32>
    %cst_134 = arith.constant dense<0.000000e+00> : vector<16xf32>
    %296 = vector.multi_reduction <add>, %291, %cst_134 [1] : vector<16x32xf32> to vector<16xf32>
    %297 = vector.shape_cast %296 : vector<16xf32> to vector<16x1xf32>
    %cst_135 = arith.constant 3.200000e+01 : f32
    %298 = vector.broadcast %cst_135 : f32 to vector<16x1xf32>
    %299 = arith.divf %297, %298 : vector<16x1xf32>
    %300 = vector.broadcast %299 : vector<16x1xf32> to vector<16x32xf32>
    %301 = arith.subf %291, %300 : vector<16x32xf32>
    %302 = arith.mulf %301, %301 : vector<16x32xf32>
    %cst_136 = arith.constant dense<0.000000e+00> : vector<16xf32>
    %303 = vector.multi_reduction <add>, %302, %cst_136 [1] : vector<16x32xf32> to vector<16xf32>
    %304 = vector.shape_cast %303 : vector<16xf32> to vector<16x1xf32>
    %cst_137 = arith.constant 3.200000e+01 : f32
    %305 = vector.broadcast %cst_137 : f32 to vector<16x1xf32>
    %306 = arith.divf %304, %305 : vector<16x1xf32>
    %307 = vector.broadcast %299 : vector<16x1xf32> to vector<16x32xf32>
    %308 = arith.subf %291, %307 : vector<16x32xf32>
    %cst_138 = arith.constant 9.99999974E-6 : f32
    %309 = vector.broadcast %cst_138 : f32 to vector<16x1xf32>
    %310 = arith.addf %306, %309 : vector<16x1xf32>
    %311 = math.rsqrt %310 : vector<16x1xf32>
    %312 = vector.broadcast %311 : vector<16x1xf32> to vector<16x32xf32>
    %313 = arith.mulf %308, %312 : vector<16x32xf32>
    %314 = vector.broadcast %293 : vector<1x32xf32> to vector<16x32xf32>
    %315 = arith.mulf %313, %314 : vector<16x32xf32>
    %316 = vector.broadcast %295 : vector<1x32xf32> to vector<16x32xf32>
    %317 = arith.addf %315, %316 : vector<16x32xf32>
    %318 = arith.truncf %317 : vector<16x32xf32> to vector<16x32xbf16>
    %cst_139 = arith.constant dense<0.000000e+00> : vector<16x128xf32>
    %319 = tpu.matmul %318, %199, %cst_139 {dimension_numbers = #tpu.dot_dimension_numbers<[1], [0], [0], [1], [0, 0, 1, 1], [], []>} : vector<16x32xbf16>, vector<32x128xbf16>, vector<16x128xf32> -> vector<16x128xf32>
    %320 = vector.broadcast %201 : vector<1x128xf32> to vector<16x128xf32>
    %321 = arith.addf %319, %320 : vector<16x128xf32>
    %cst_140 = arith.constant 5.000000e-01 : f32
    %322 = vector.broadcast %cst_140 : f32 to vector<16x128xf32>
    %323 = arith.mulf %322, %321 : vector<16x128xf32>
    %cst_141 = arith.constant 0.707106769 : f32
    %324 = vector.broadcast %cst_141 : f32 to vector<16x128xf32>
    %325 = arith.mulf %321, %324 : vector<16x128xf32>
    %326 = math.erf %325 : vector<16x128xf32>
    %cst_142 = arith.constant 1.000000e+00 : f32
    %327 = vector.broadcast %cst_142 : f32 to vector<16x128xf32>
    %328 = arith.addf %327, %326 : vector<16x128xf32>
    %329 = arith.mulf %323, %328 : vector<16x128xf32>
    %330 = arith.truncf %329 : vector<16x128xf32> to vector<16x128xbf16>
    %cst_143 = arith.constant dense<0.000000e+00> : vector<16x32xf32>
    %331 = tpu.matmul %330, %204, %cst_143 {dimension_numbers = #tpu.dot_dimension_numbers<[1], [0], [0], [1], [0, 0, 1, 1], [], []>} : vector<16x128xbf16>, vector<128x32xbf16>, vector<16x32xf32> -> vector<16x32xf32>
    %332 = vector.broadcast %206 : vector<1x32xf32> to vector<16x32xf32>
    %333 = arith.addf %331, %332 : vector<16x32xf32>
    %334 = arith.addf %317, %333 : vector<16x32xf32>
    %c1_144 = arith.constant 1 : index
    %c0_145 = arith.constant 0 : index
    %c0_146 = arith.constant 0 : index
    %335 = vector.load %arg15[%c1_144, %c0_145, %c0_146] : memref<2x1x32xf32, #tpu.memory_space<vmem>>, vector<1x1x32xf32>
    %336 = vector.shape_cast %335 : vector<1x1x32xf32> to vector<1x32xf32>
    %c1_147 = arith.constant 1 : index
    %c0_148 = arith.constant 0 : index
    %c0_149 = arith.constant 0 : index
    %337 = vector.load %arg16[%c1_147, %c0_148, %c0_149] : memref<2x1x32xf32, #tpu.memory_space<vmem>>, vector<1x1x32xf32>
    %338 = vector.shape_cast %337 : vector<1x1x32xf32> to vector<1x32xf32>
    %cst_150 = arith.constant dense<0.000000e+00> : vector<16xf32>
    %339 = vector.multi_reduction <add>, %334, %cst_150 [1] : vector<16x32xf32> to vector<16xf32>
    %340 = vector.shape_cast %339 : vector<16xf32> to vector<16x1xf32>
    %cst_151 = arith.constant 3.200000e+01 : f32
    %341 = vector.broadcast %cst_151 : f32 to vector<16x1xf32>
    %342 = arith.divf %340, %341 : vector<16x1xf32>
    %343 = vector.broadcast %342 : vector<16x1xf32> to vector<16x32xf32>
    %344 = arith.subf %334, %343 : vector<16x32xf32>
    %345 = arith.mulf %344, %344 : vector<16x32xf32>
    %cst_152 = arith.constant dense<0.000000e+00> : vector<16xf32>
    %346 = vector.multi_reduction <add>, %345, %cst_152 [1] : vector<16x32xf32> to vector<16xf32>
    %347 = vector.shape_cast %346 : vector<16xf32> to vector<16x1xf32>
    %cst_153 = arith.constant 3.200000e+01 : f32
    %348 = vector.broadcast %cst_153 : f32 to vector<16x1xf32>
    %349 = arith.divf %347, %348 : vector<16x1xf32>
    %350 = vector.broadcast %342 : vector<16x1xf32> to vector<16x32xf32>
    %351 = arith.subf %334, %350 : vector<16x32xf32>
    %cst_154 = arith.constant 9.99999974E-6 : f32
    %352 = vector.broadcast %cst_154 : f32 to vector<16x1xf32>
    %353 = arith.addf %349, %352 : vector<16x1xf32>
    %354 = math.rsqrt %353 : vector<16x1xf32>
    %355 = vector.broadcast %354 : vector<16x1xf32> to vector<16x32xf32>
    %356 = arith.mulf %351, %355 : vector<16x32xf32>
    %357 = vector.broadcast %336 : vector<1x32xf32> to vector<16x32xf32>
    %358 = arith.mulf %356, %357 : vector<16x32xf32>
    %359 = vector.broadcast %338 : vector<1x32xf32> to vector<16x32xf32>
    %360 = arith.addf %358, %359 : vector<16x32xf32>
    %c0_155 = arith.constant 0 : index
    %c0_156 = arith.constant 0 : index
    %361 = vector.load %arg17[%c0_155, %c0_156] : memref<1x32xf32, #tpu.memory_space<vmem>>, vector<1x32xf32>
    %c0_157 = arith.constant 0 : index
    %c0_158 = arith.constant 0 : index
    %362 = vector.load %arg18[%c0_157, %c0_158] : memref<1x32xf32, #tpu.memory_space<vmem>>, vector<1x32xf32>
    %cst_159 = arith.constant dense<0.000000e+00> : vector<16xf32>
    %363 = vector.multi_reduction <add>, %360, %cst_159 [1] : vector<16x32xf32> to vector<16xf32>
    %364 = vector.shape_cast %363 : vector<16xf32> to vector<16x1xf32>
    %cst_160 = arith.constant 3.200000e+01 : f32
    %365 = vector.broadcast %cst_160 : f32 to vector<16x1xf32>
    %366 = arith.divf %364, %365 : vector<16x1xf32>
    %367 = vector.broadcast %366 : vector<16x1xf32> to vector<16x32xf32>
    %368 = arith.subf %360, %367 : vector<16x32xf32>
    %369 = arith.mulf %368, %368 : vector<16x32xf32>
    %cst_161 = arith.constant dense<0.000000e+00> : vector<16xf32>
    %370 = vector.multi_reduction <add>, %369, %cst_161 [1] : vector<16x32xf32> to vector<16xf32>
    %371 = vector.shape_cast %370 : vector<16xf32> to vector<16x1xf32>
    %cst_162 = arith.constant 3.200000e+01 : f32
    %372 = vector.broadcast %cst_162 : f32 to vector<16x1xf32>
    %373 = arith.divf %371, %372 : vector<16x1xf32>
    %374 = vector.broadcast %366 : vector<16x1xf32> to vector<16x32xf32>
    %375 = arith.subf %360, %374 : vector<16x32xf32>
    %cst_163 = arith.constant 9.99999974E-6 : f32
    %376 = vector.broadcast %cst_163 : f32 to vector<16x1xf32>
    %377 = arith.addf %373, %376 : vector<16x1xf32>
    %378 = math.rsqrt %377 : vector<16x1xf32>
    %379 = vector.broadcast %378 : vector<16x1xf32> to vector<16x32xf32>
    %380 = arith.mulf %375, %379 : vector<16x32xf32>
    %381 = vector.broadcast %361 : vector<1x32xf32> to vector<16x32xf32>
    %382 = arith.mulf %380, %381 : vector<16x32xf32>
    %383 = vector.broadcast %362 : vector<1x32xf32> to vector<16x32xf32>
    %384 = arith.addf %382, %383 : vector<16x32xf32>
    %385 = arith.truncf %384 : vector<16x32xf32> to vector<16x32xbf16>
    %c0_164 = arith.constant 0 : index
    %c0_165 = arith.constant 0 : index
    %386 = vector.load %arg19[%c0_164, %c0_165] : memref<32x96xf32, #tpu.memory_space<vmem>>, vector<32x96xf32>
    %387 = arith.truncf %386 : vector<32x96xf32> to vector<32x96xbf16>
    %cst_166 = arith.constant dense<0.000000e+00> : vector<16x96xf32>
    %388 = tpu.matmul %385, %387, %cst_166 {dimension_numbers = #tpu.dot_dimension_numbers<[1], [0], [0], [1], [0, 0, 1, 1], [], []>} : vector<16x32xbf16>, vector<32x96xbf16>, vector<16x96xf32> -> vector<16x96xf32>
    %c0_167 = arith.constant 0 : index
    %c0_168 = arith.constant 0 : index
    %389 = vector.load %arg20[%c0_167, %c0_168] : memref<1x96xf32, #tpu.memory_space<vmem>>, vector<1x96xf32>
    %390 = vector.broadcast %389 : vector<1x96xf32> to vector<16x96xf32>
    %391 = arith.addf %388, %390 : vector<16x96xf32>
    %c0_169 = arith.constant 0 : index
    %c0_170 = arith.constant 0 : index
    %392 = vector.load %arg21[%c0_169, %c0_170] : memref<16x96xf32, #tpu.memory_space<vmem>>, vector<16x96xf32>
    tpu.vector_store %arg21[%c0_169, %c0_170], %391 {strides = array<i32>} : memref<16x96xf32, #tpu.memory_space<vmem>>, vector<16x96xf32>,
    return
  }
}

</mosaic_0001>

<bundles_post_ra>
// kernel: gpt_forward.1
= control target key start
LH: loop header
LB: loop body
LE: loop exit
PB: predicated region body
PF: predicated region fallthrough
CT: control target
= control target key end

     0   :  { %s4411_s0 = inlined_call_operand.vmem [shape: s32[16,1], index: 0, kind: input, shape index: {}]   ;;  %s4412_s1 = inlined_call_operand.vmem [shape: f32[16,16], index: 1, kind: input, shape index: {}]   ;;  %s4413_s2 = inlined_call_operand.vmem [shape: f32[16,16], index: 2, kind: input, shape index: {}]   ;;  %s4414_s3 = inlined_call_operand.vmem [shape: f32[96,32], index: 3, kind: input, shape index: {}]   ;;  %s4415_s4 = inlined_call_operand.vmem [shape: f32[16,32], index: 4, kind: input, shape index: {}]   ;;  %s4416_s5 = inlined_call_operand.vmem [shape: f32[2,32,96], index: 5, kind: input, shape index: {}]   ;;  %s4417_s6 = inlined_call_operand.vmem [shape: f32[2,1,96], index: 6, kind: input, shape index: {}]   ;;  %s4418_s7 = inlined_call_operand.vmem [shape: f32[2,32,32], index: 7, kind: input, shape index: {}]   ;;  %s4419_s8 = inlined_call_operand.vmem [shape: f32[2,1,32], index: 8, kind: input, shape index: {}]   ;;  %s4420_s9 = inlined_call_operand.vmem [shape: f32[2,1,32], index: 9, kind: input, shape index: {}]   ;;  %s4421_s10 = inlined_call_operand.vmem [shape: f32[2,1,32], index: 10, kind: input, shape index: {}]   ;;  %s4422_s11 = inlined_call_operand.vmem [shape: f32[2,32,128], index: 11, kind: input, shape index: {}]   ;;  %s4423_s12 = inlined_call_operand.vmem [shape: f32[2,1,128], index: 12, kind: input, shape index: {}]   ;;  %s4424_s13 = inlined_call_operand.vmem [shape: f32[2,128,32], index: 13, kind: input, shape index: {}]   ;;  %s4425_s14 = inlined_call_operand.vmem [shape: f32[2,1,32], index: 14, kind: input, shape index: {}]   ;;  %s4426_s15 = inlined_call_operand.vmem [shape: f32[2,1,32], index: 15, kind: input, shape index: {}]   ;;  %s4427_s16 = inlined_call_operand.vmem [shape: f32[2,1,32], index: 16, kind: input, shape index: {}]   ;;  %s4428_s17 = inlined_call_operand.vmem [shape: f32[1,32], index: 17, kind: input, shape index: {}]   ;;  %s4429_s18 = inlined_call_operand.vmem [shape: f32[1,32], index: 18, kind: input, shape index: {}]   ;;  %s4430_s19 = inlined_call_operand.vmem [shape: f32[32,96], index: 19, kind: input, shape index: {}]   ;;  %s4431_s20 = inlined_call_operand.vmem [shape: f32[1,96], index: 20, kind: input, shape index: {}]   ;;  %s4432_s21 = inlined_call_operand.hbm [shape: f32[16,96], index: 21, kind: output, shape index: {}]  }
   0x1   :  { %4453 = sst [smem:[#allocation5_spill]] %s4411_s0 }
   0x2   :  { %4454 = sst [smem:[#allocation6_spill]] %s4412_s1 }
   0x3   :  { %4455 = sst [smem:[#allocation7_spill]] %s4413_s2 }
   0x4   :  { %4456 = sst [smem:[#allocation8_spill]] %s4414_s3 }
   0x5   :  { %4457 = sst [smem:[#allocation9_spill]] %s4415_s4 }
   0x6   :  { %4458 = sst [smem:[#allocation10_spill]] %s4416_s5 }
   0x7   :  { %4459 = sst [smem:[#allocation11_spill]] %s4427_s16 }
   0x8   :  { %s4460_s26 = sld [smem:[#allocation5_spill]]  ;;  %s4461_s16 = sld [smem:[#allocation9_spill]]  ;;  %vm102_vm0 = vcmask 130048   ;;  %v3627_v2 = vmov 0  }
   0x9   :  { %3398 = vset.pattern.permute.xlu0 %v3627_v2  ;;  %s4462_s30 = sld [smem:[#allocation6_spill]]  ;;  %s4463_s23 = sld [smem:[#allocation8_spill]] }
   0xe   :  { %v70_v0 = vld [vmem:[%s4460_s26] sm:$0xff]  ;;  %v101_v3 = vld [vmem:[%s4461_s16 + $0x8] sm:$0xff] }
   0xf   :  { %v100_v1 = vld [vmem:[%s4461_s16] sm:$0xff]  ;;  %75 = vperm.xlu0 %3398, %v70_v0   ;;  %v87_v7 = vld [vmem:[%s4463_s23 + $0x8] sm:$0xff]  ;;  %v88_v10 = vld [vmem:[%s4463_s23 + $0x10] sm:$0xff] }
  0x10   :  { %v98_v4 = vld [vmem:[%s4462_s30] sm:$0xff]  ;;  %v3269_v6 = vpack.c.bf16 %v101_v3, %v100_v1  ;;  %v71_v8 = vld [vmem:[%s4460_s26 + $0x8] sm:$0xff]  ;;  %v89_v11 = vld [vmem:[%s4463_s23 + $0x18] sm:$0xff] }
  0x11   :  { %v86_v5 = vld [vmem:[%s4463_s23] sm:$0xff]  ;;  %3031 = vmatprep.mubr.msk.f32.mxu0 %vm102_vm0, %v98_v4  ;;  %v99_v12 = vld [vmem:[%s4462_s30 + $0x8] sm:$0xff]  ;;  %v3277_v13 = vpack.c.bf16 %v89_v11, %v88_v10 }
  0x12   :  { %v3273_v9 = vpack.c.bf16 %v87_v7, %v86_v5  ;;  %3270 = vmatprep.subr.bf16.mxu0 %v3269_v6 }
  0x13   :  { %3272 = vmatpush3.bf16.msra.mxu0 %v3269_v6  ;;  %78 = vperm.xlu0 %3398, %v71_v8  }
  0x14   :  { %3274 = vmatprep.subr.bf16.mxu0 %v3273_v9 }
  0x15   :  { %26 = vsyncpa [#allocation3], 0  ;;  %v90_v14 = vld [vmem:[%s4463_s23 + $0x20] sm:$0xff]  ;;  %v91_v15 = vld [vmem:[%s4463_s23 + $0x28] sm:$0xff]  ;;  %v3628_v26 = vmov 0.0   ;;  %v72_v27 = vlaneseq  ;;  %vm184_vm1 = vcmask 785408  }
  0x16   :  { %3032 = vmatmul.mubr.msk.f32.vlgmr.msra.gmra.mrb[0].mxu0 %vm102_vm0, %v99_v12  ;;  %v3281_v16 = vpack.c.bf16 %v91_v15, %v90_v14  ;;  %v92_v17 = vld [vmem:[%s4463_s23 + $0x30] sm:$0xff]  ;;  %v93_v18 = vld [vmem:[%s4463_s23 + $0x38] sm:$0xff]  ;;  %v94_v20 = vld [vmem:[%s4463_s23 + $0x40] sm:$0xff]  ;;  %s4464_s22 = sld [smem:[#allocation10_spill]]  ;;  %vm3629_vm4 = vmmov 0   ;;  %vm321_vm5 = vcmask 261120  }
  0x17   :  { %3276 = vmatpush3.bf16.msra.mxu0 %v3273_v9  ;;  %v3285_v19 = vpack.c.bf16 %v93_v18, %v92_v17  ;;  %v95_v21 = vld [vmem:[%s4463_s23 + $0x48] sm:$0xff]  ;;  %v96_v23 = vld [vmem:[%s4463_s23 + $0x50] sm:$0xff]  ;;  %v97_v24 = vld [vmem:[%s4463_s23 + $0x58] sm:$0xff]  ;;  %v73_v28 = vand.u32 127, %v72_v27  ;;  %vm372_vm6 = vcmask 64512   ;;  %s3630_s3 = smov 96  }
  0x18   :  { %3278 = vmatprep.subr.bf16.mxu0 %v3277_v13  ;;  %v3289_v22 = vpack.c.bf16 %v95_v21, %v94_v20  ;;  %v3293_v25 = vpack.c.bf16 %v97_v24, %v96_v23  ;;  %v2796_v42 = vld [vmem:[%s4417_s6] ss:$0 sm:$0xff]  ;;  %vm3856_vm7 = vmpackc.low %vm372_vm6, %vm372_vm6  ;;  %s4467_s0 = sld [smem:[#allocation7_spill]]  ;;  %s3631_s5 = smov 88   ;;  %vm1209_vm8 = vcmask 195584  }
  0x19   :  { %s3632_s1 = smov 120   ;;  %s4450_s23 = smov 64  }
  0x1a   :  { %s3634_s24 = smov 80   ;;  %s4451_s30 = smov 112  }
  0x1b   :  { %3280 = vmatpush3.bf16.msra.mxu0 %v3277_v13  ;;  %s4446_s2 = smov 56   ;;  %s4447_s25 = smov 72  }
  0x1c   :  { %3282 = vmatprep.subr.bf16.mxu0 %v3281_v16  ;;  %v268_v30 = vld [vmem:[%s4464_s22] sm:$0xff]  ;;  %v269_v31 = vld [vmem:[%s4464_s22 + $0x8] sm:$0xff]  ;;  %v270_v36 = vld [vmem:[%s4464_s22 + $0x10] sm:$0xff]  ;;  %s4448_s16 = smov 48   ;;  %s4444_s27 = smov 104  }
  0x1d   :  { %v272_v34 = vpack.c.bf16 %v269_v31, %v268_v30  ;;  %v271_v37 = vld [vmem:[%s4464_s22 + $0x18] sm:$0xff]  ;;  %s4440_s28 = smov 8   ;;  %s4442_s29 = smov 16  }
  0x1e   :  { %v273_v38 = vpack.c.bf16 %v271_v37, %v270_v36  ;;  %v3869_v56 = vld [vmem:[%s4467_s0 + $0x8] sm:$0xff]  ;;  %v3874_v59 = vld [vmem:[%s4467_s0] sm:$0xff]  ;;  %s4443_s26 = smov 40   ;;  %s4473_s4 = smov 56  }
  0x1f   :  { %3284 = vmatpush3.bf16.msra.mxu0 %v3281_v16 }
  0x20   :  { %3286 = vmatprep.subr.bf16.mxu0 %v3285_v19 }
  0x23   :  { %3288 = vmatpush3.bf16.msra.mxu0 %v3285_v19 }
  0x24   :  { %3290 = vmatprep.subr.bf16.mxu0 %v3289_v22 }
  0x27   :  { %3292 = vmatpush3.bf16.msra.mxu0 %v3289_v22 }
  0x28   :  { %3294 = vmatprep.subr.bf16.mxu0 %v3293_v25 }
  0x2b   :  { %3296 = vmatpush3.bf16.msra.mxu0 %v3293_v25 }
  0x2c   :  { %3061 = vmatprep.subr.bf16.mxu0 %v3628_v26 }
  0x8e   :  { %v76_v29 = vpop.permute.xlu0 %75 }
  0x8f   :  { %vm80_vm2 = vcmp.eq.s32.totalorder %v76_v29, %v73_v28 }
  0x90   :  { %v2790_v32 = vsel %vm80_vm2, 1.0, %v3628_v26 }
  0x91   :  { %3058 = vmatprep.mubr.msk.f32.mxu0 %vm184_vm1, %v2790_v32 }
  0x92   :  { %v79_v33 = vpop.permute.xlu0 %78 }
  0x93   :  { %vm81_vm3 = vcmp.eq.s32.totalorder %v79_v33, %v73_v28 }
  0x94   :  { %v2791_v35 = vsel %vm81_vm3, 1.0, %v3628_v26 }
  0x95   :  { %3059 = vmatmul.mubr.msk.f32.vlgmr.msra.gmra.mrb[0].mxu0 %vm184_vm1, %v2791_v35 }
  0x96   :  { %3062 = vmatpush3.bf16.msra.mxu0 %v272_v34  ;;  %3065 = vmatprep.mubr.msk.bf16.mxu0 %vm3629_vm4, %v3628_v26 }
  0x97   :  { %3063 = vmatprep.subr.bf16.mxu0 %v3628_v26 }
  0x9a   :  { %3064 = vmatpush3.bf16.msra.mxu0 %v273_v38 }
 0x168   :  { %v3832_v39 = vpop.f32.mrb[0].mxu0 }
 0x169   :  { %v3834_v40 = vpop.f32.mrb[1].mxu0 }
 0x16a   :  { %v314_v41 = vpack.c.bf16 %v3832_v39, %v3834_v40 }
 0x16c   :  { %3066 = vmatmul.mubr.msk.bf16.vlgmr.msra.gmra.mrb[4].mxu0 %vm321_vm5, %v314_v41 }
 0x23f   :  { %v359_v43 = vpop.f32.mrb[4].mxu0 }
 0x240   :  { %v3842_v44 = vadd.f32 %v2796_v42, %v359_v43  ;;  %v3067_v45 = vpop.f32.mrb[5].mxu0 }
 0x241   :  { %v362_v46 = vpop.f32.mrb[6].mxu0 }
 0x242   :  { %v3844_v47 = vadd.f32 %v2796_v42, %v362_v46  ;;  %v3068_v48 = vpop.f32.mrb[7].mxu0  ;;  %3073 = vmatprep.mubr.msk.f32.mxu1 %vm372_vm6, %v3842_v44 }
 0x244   :  { %v3850_v49 = vpack.i.bf16 %v3844_v47, %v3842_v44 }
 0x246   :  { %3400 = vrot.lane.b32.xlu1 %v3850_v49, %s3630_s3 }
 0x2b8   :  { %v3401_v50 = vpop.permute.xlu1 %3400 }
 0x2b9   :  { %v3403_v51 = vunpack.i.h.bf16 %v3401_v50  ;;  %v3402_v52 = vunpack.i.l.bf16 %v3401_v50 }
 0x2bb   :  { %v3297_v54 = vpack.c.bf16 %v3403_v51, %v3402_v52 }
 0x2bd   :  { %3299 = vmatprep.subr.msk.bf16.mxu1 %vm3856_vm7, %v3297_v54 }
 0x2be   :  { %3302 = vmatpush3.bf16.xpose.msk.msra.mxu1 %vm3856_vm7, %v3297_v54 }
 0x2c5   :  { %3074 = vmatmul.mubr.msk.f32.vlgmr.msra.gmra.mrb[0].mxu1 %vm372_vm6, %v3844_v47 }
 0x398   :  { %v3075_v55 = vpop.f32.mrb[0].mxu1 }
 0x399   :  { %v457_v57 = vmul.f32 0.35355338, %v3075_v55  ;;  %v447_v58 = vpop.f32.mrb[1].mxu1 }
 0x39a   :  { %v456_v60 = vmul.f32 0.35355338, %v447_v58 }
 0x39b   :  { %v459_v61 = vadd.f32 %v457_v57, %v3869_v56 }
 0x39c   :  { %v458_v62 = vadd.f32 %v456_v60, %v3874_v59 }
 0x39d   :  { %v463_v63 = vsel %vm102_vm0, %v459_v61, -inf }
 0x39e   :  { %464 = vmax.xlane.f32.xlu0 %v463_v63  ;;  %v460_v0 = vsel %vm102_vm0, %v458_v62, -inf }
 0x39f   :  { %461 = vmax.xlane.f32.xlu1 %v460_v0 }
 0x42b   :  { %v465_v1 = vpop.xlane.xlu0 %464 }
 0x42c   :  { %v467_v2 = vsub.f32 %v459_v61, %v465_v1  ;;  %v462_v3 = vpop.xlane.xlu1 %461 }
 0x42d   :  { %v466_v4 = vsub.f32 %v458_v62, %v462_v3 }
 0x42e   :  { %v470_v5 = vmul.f32 1.442695, %v467_v2 }
 0x42f   :  { %v468_v6 = vmul.f32 1.442695, %v466_v4 }
 0x430   :  { %3509 = vpow2.f32 %v470_v5 }
 0x431   :  { %3511 = vpow2.f32 %v468_v6 }
 0x43a   :  { %v3510_v7 = vpop.eup %3509 }
 0x43b   :  { %v3512_v8 = vpop.eup %3511  ;;  %v475_v9 = vsel %vm102_vm0, %v3510_v7, 0.0 }
 0x43c   :  { %476 = vadd.xlane.f32.xlu1 %v475_v9  ;;  %v472_v10 = vsel %vm102_vm0, %v3512_v8, 0.0 }
 0x43d   :  { %473 = vadd.xlane.f32.xlu0 %v472_v10 }
 0x44d   :  { %3410 = vrot.lane.b32.xlu1 %v3850_v49, %s3631_s5 }
 0x451   :  { %569 = vrot.lane.b32.xlu1 %v3842_v44, %s3632_s1 }
 0x453   :  { %3405 = vrot.lane.b32.xlu0 %v3850_v49, %s4450_s23  ;;  %s4475_s23 = smov 40  }
 0x455   :  { %571 = vrot.lane.b32.xlu1 %v3844_v47, %s3632_s1 }
 0x457   :  { %3415 = vrot.lane.b32.xlu0 %v3850_v49, %s3634_s24 }
 0x459   :  { %775 = vrot.lane.b32.xlu1 %v3844_v47, %s4451_s30 }
 0x45b   :  { %773 = vrot.lane.b32.xlu0 %v3842_v44, %s4451_s30  ;;  %s4476_s30 = smov 16  }
 0x4c9   :  { %v477_v11 = vpop.xlane.xlu1 %476 }
 0x4ca   :  { %3513 = vrcp.f32 %v477_v11  ;;  %v474_v12 = vpop.xlane.xlu0 %473 }
 0x4cb   :  { %3515 = vrcp.f32 %v474_v12 }
 0x4cd   :  { %v3411_v13 = vpop.permute.xlu1 %3410 }
 0x4ce   :  { %v3406_v14 = vpop.permute.xlu0 %3405  ;;  %v3413_v15 = vunpack.i.h.bf16 %v3411_v13  ;;  %v3412_v16 = vunpack.i.l.bf16 %v3411_v13 }
 0x4cf   :  { %v3408_v17 = vunpack.i.h.bf16 %v3406_v14  ;;  %v3407_v18 = vunpack.i.l.bf16 %v3406_v14 }
 0x4d0   :  { %v3307_v20 = vpack.c.bf16 %v3413_v15, %v3412_v16 }
 0x4d1   :  { %v3303_v19 = vpack.c.bf16 %v3408_v17, %v3407_v18  ;;  %v570_v29 = vpop.permute.xlu1 %569 }
 0x4d2   :  { %v3416_v23 = vpop.permute.xlu0 %3415 }
 0x4d3   :  { %3304 = vmatprep.subr.bf16.mxu1 %v3303_v19  ;;  %v3418_v27 = vunpack.i.h.bf16 %v3416_v23  ;;  %v3417_v28 = vunpack.i.l.bf16 %v3416_v23 }
 0x4d4   :  { %v3514_v21 = vpop.eup %3513  ;;  %3306 = vmatpush3.bf16.msra.mxu1 %v3303_v19 }
 0x4d5   :  { %v3516_v22 = vpop.eup %3515  ;;  %3309 = vmatprep.subr.msk.bf16.mxu1 %vm3856_vm7, %v3307_v20  ;;  %v481_v25 = vmul.f32 %v3514_v21, %v3510_v7  ;;  %v3317_v30 = vpack.c.bf16 %v3418_v27, %v3417_v28  ;;  %v572_v31 = vpop.permute.xlu1 %571 }
 0x4d6   :  { %v480_v24 = vmul.f32 %v3516_v22, %v3512_v8  ;;  %v774_v32 = vpop.permute.xlu0 %773 }
 0x4d8   :  { %3080 = vmatprep.mubr.msk.f32.mxu1 %vm102_vm0, %v480_v24 }
 0x4d9   :  { %3081 = vmatmul.mubr.msk.f32.vlgmr.msra.gmra.mrb[2].mxu1 %vm102_vm0, %v481_v25  ;;  %v776_v33 = vpop.permute.xlu1 %775 }
 0x4da   :  { %3087 = vmatprep.mubr.msk.f32.mxu1 %vm372_vm6, %v570_v29 }
 0x4dd   :  { %3312 = vmatpush3.bf16.xpose.msk.msra.mxu1 %vm3856_vm7, %v3307_v20 }
 0x4de   :  { %3319 = vmatprep.subr.msk.bf16.mxu1 %vm3856_vm7, %v3317_v30 }
 0x4e4   :  { %3088 = vmatmul.mubr.msk.f32.vlgmr.msra.gmra.mrb[4].mxu1 %vm372_vm6, %v572_v31 }
 0x4e5   :  { %3322 = vmatpush3.bf16.xpose.msk.msra.mxu1 %vm3856_vm7, %v3317_v30  ;;  %3101 = vmatprep.mubr.msk.f32.mxu1 %vm372_vm6, %v774_v32 }
 0x4ec   :  { %3102 = vmatmul.mubr.msk.f32.vlgmr.msra.gmra.mrb[6].mxu1 %vm372_vm6, %v776_v33 }
 0x5ac   :  { %v3910_v34 = vpop.f32.mrb[2].mxu1 }
 0x5ad   :  { %v3912_v35 = vpop.f32.mrb[3].mxu1 }
 0x5b7   :  { %v3089_v36 = vpop.f32.mrb[4].mxu1 }
 0x5b8   :  { %v661_v37 = vmul.f32 0.35355338, %v3089_v36  ;;  %v651_v38 = vpop.f32.mrb[5].mxu1 }
 0x5b9   :  { %v660_v41 = vmul.f32 0.35355338, %v651_v38 }
 0x5ba   :  { %v663_v42 = vadd.f32 %v661_v37, %v3869_v56 }
 0x5bb   :  { %v662_v43 = vadd.f32 %v660_v41, %v3874_v59 }
 0x5bc   :  { %v667_v45 = vsel %vm102_vm0, %v663_v42, -inf }
 0x5bd   :  { %668 = vmax.xlane.f32.xlu1 %v667_v45  ;;  %v664_v46 = vsel %vm102_vm0, %v662_v43, -inf }
 0x5be   :  { %665 = vmax.xlane.f32.xlu0 %v664_v46 }
 0x5bf   :  { %v3103_v48 = vpop.f32.mrb[6].mxu1 }
 0x5c0   :  { %v855_v50 = vpop.f32.mrb[7].mxu1  ;;  %v865_v51 = vmul.f32 0.35355338, %v3103_v48 }
 0x5c1   :  { %v864_v52 = vmul.f32 0.35355338, %v855_v50 }
 0x5c2   :  { %v867_v57 = vadd.f32 %v865_v51, %v3869_v56 }
 0x5c3   :  { %v866_v54 = vadd.f32 %v864_v52, %v3874_v59 }
 0x5c4   :  { %v871_v58 = vsel %vm102_vm0, %v867_v57, -inf }
 0x5c5   :  { %v868_v55 = vsel %vm102_vm0, %v866_v54, -inf }
 0x5c6   :  { %869 = vmax.xlane.f32.xlu0 %v868_v55 }
 0x5ca   :  { %872 = vmax.xlane.f32.xlu0 %v871_v58 }
 0x5ce   :  { %3420 = vrot.lane.b32.xlu1 %v3850_v49, %s4446_s2 }
 0x64a   :  { %v669_v60 = vpop.xlane.xlu1 %668 }
 0x64b   :  { %v671_v61 = vsub.f32 %v663_v42, %v669_v60  ;;  %v666_v62 = vpop.xlane.xlu0 %665 }
 0x64c   :  { %v670_v63 = vsub.f32 %v662_v43, %v666_v62 }
 0x64d   :  { %v674_v0 = vmul.f32 1.442695, %v671_v61 }
 0x64e   :  { %v672_v1 = vmul.f32 1.442695, %v670_v63  ;;  %v3421_v2 = vpop.permute.xlu1 %3420 }
 0x64f   :  { %3517 = vpow2.f32 %v674_v0  ;;  %v3423_v3 = vunpack.i.h.bf16 %v3421_v2  ;;  %v3422_v4 = vunpack.i.l.bf16 %v3421_v2 }
 0x650   :  { %3519 = vpow2.f32 %v672_v1 }
 0x651   :  { %v3313_v5 = vpack.c.bf16 %v3423_v3, %v3422_v4 }
 0x653   :  { %3314 = vmatprep.subr.bf16.mxu0 %v3313_v5  ;;  %v870_v6 = vpop.xlane.xlu0 %869 }
 0x654   :  { %3316 = vmatpush3.bf16.msra.mxu0 %v3313_v5  ;;  %v874_v16 = vsub.f32 %v866_v54, %v870_v6 }
 0x656   :  { %v876_v17 = vmul.f32 1.442695, %v874_v16 }
 0x657   :  { %v873_v7 = vpop.xlane.xlu0 %872 }
 0x658   :  { %v875_v8 = vsub.f32 %v867_v57, %v873_v7 }
 0x659   :  { %v3518_v9 = vpop.eup %3517 }
 0x65a   :  { %v3520_v10 = vpop.eup %3519  ;;  %v878_v11 = vmul.f32 1.442695, %v875_v8  ;;  %v679_v12 = vsel %vm102_vm0, %v3518_v9, 0.0 }
 0x65b   :  { %680 = vadd.xlane.f32.xlu0 %v679_v12  ;;  %v676_v13 = vsel %vm102_vm0, %v3520_v10, 0.0 }
 0x65c   :  { %3521 = vpow2.f32 %v878_v11  ;;  %677 = vadd.xlane.f32.xlu1 %v676_v13 }
 0x65d   :  { %3523 = vpow2.f32 %v876_v17 }
 0x666   :  { %v3522_v14 = vpop.eup %3521 }
 0x667   :  { %v883_v15 = vsel %vm102_vm0, %v3522_v14, 0.0  ;;  %v3524_v18 = vpop.eup %3523 }
 0x668   :  { %884 = vadd.xlane.f32.xlu0 %v883_v15  ;;  %v880_v19 = vsel %vm102_vm0, %v3524_v18, 0.0 }
 0x66d   :  { %3430 = vrot.lane.b32.xlu1 %v3850_v49, %s4447_s25  ;;  %s4468_s25 = sld [smem:[#allocation11_spill]] }
 0x67e   :  { %3425 = vrot.lane.b32.xlu0 %v3850_v49, %s4448_s16 }
 0x682   :  { %979 = vrot.lane.b32.xlu0 %v3844_v47, %s4444_s27 }
 0x691   :  { %881 = vadd.xlane.f32.xlu1 %v880_v19 }
 0x6a2   :  { %977 = vrot.lane.b32.xlu1 %v3842_v44, %s4444_s27 }
 0x6e8   :  { %v681_v20 = vpop.xlane.xlu0 %680 }
 0x6e9   :  { %3525 = vrcp.f32 %v681_v20  ;;  %v678_v21 = vpop.xlane.xlu1 %677 }
 0x6ea   :  { %3527 = vrcp.f32 %v678_v21  ;;  %v276_v21 = vld [vmem:[%s4418_s7 + $0x8] sm:$0xff] }
 0x6ed   :  { %v3431_v28 = vpop.permute.xlu1 %3430 }
 0x6ee   :  { %v3433_v29 = vunpack.i.h.bf16 %v3431_v28  ;;  %v3432_v30 = vunpack.i.l.bf16 %v3431_v28 }
 0x6f0   :  { %v3327_v33 = vpack.c.bf16 %v3433_v29, %v3432_v30 }
 0x6f3   :  { %v3526_v22 = vpop.eup %3525 }
 0x6f4   :  { %v3528_v23 = vpop.eup %3527  ;;  %v685_v27 = vmul.f32 %v3526_v22, %v3518_v9 }
 0x6f5   :  { %v885_v24 = vpop.xlane.xlu0 %884  ;;  %v684_v25 = vmul.f32 %v3528_v23, %v3520_v10  ;;  %v277_v23 = vld [vmem:[%s4418_s7 + $0x10] sm:$0xff] }
 0x6f6   :  { %3529 = vrcp.f32 %v885_v24  ;;  %v278_v24 = vld [vmem:[%s4418_s7 + $0x18] sm:$0xff] }
 0x6f7   :  { %3094 = vmatprep.mubr.msk.f32.mxu0 %vm102_vm0, %v684_v25  ;;  %v280_v25 = vpack.c.bf16 %v278_v24, %v277_v23 }
 0x6f8   :  { %3095 = vmatmul.mubr.msk.f32.vlgmr.msra.gmra.mrb[2].mxu0 %vm102_vm0, %v685_v27 }
 0x6f9   :  { %v3426_v47 = vpop.permute.xlu0 %3425 }
 0x6fa   :  { %v3428_v31 = vunpack.i.h.bf16 %v3426_v47  ;;  %v3427_v32 = vunpack.i.l.bf16 %v3426_v47 }
 0x6fc   :  { %v3323_v44 = vpack.c.bf16 %v3428_v31, %v3427_v32 }
 0x6fd   :  { %v980_v45 = vpop.permute.xlu0 %979 }
 0x6fe   :  { %3324 = vmatprep.subr.bf16.mxu0 %v3323_v44 }
 0x6ff   :  { %3326 = vmatpush3.bf16.msra.mxu0 %v3323_v44 }
 0x700   :  { %3329 = vmatprep.subr.msk.bf16.mxu0 %vm3856_vm7, %v3327_v33  ;;  %v3530_v37 = vpop.eup %3529 }
 0x701   :  { %v889_v42 = vmul.f32 %v3530_v37, %v3522_v14 }
 0x71e   :  { %v882_v36 = vpop.xlane.xlu1 %881 }
 0x71f   :  { %3531 = vrcp.f32 %v882_v36 }
 0x722   :  { %v978_v43 = vpop.permute.xlu1 %977 }
 0x729   :  { %v3532_v38 = vpop.eup %3531 }
 0x72a   :  { %v888_v41 = vmul.f32 %v3532_v38, %v3524_v18 }
 0x72c   :  { %3108 = vmatprep.mubr.msk.f32.mxu0 %vm102_vm0, %v888_v41 }
 0x72d   :  { %3109 = vmatmul.mubr.msk.f32.vlgmr.msra.gmra.mrb[8].mxu0 %vm102_vm0, %v889_v42 }
 0x72e   :  { %3332 = vmatpush3.bf16.xpose.msk.msra.mxu0 %vm3856_vm7, %v3327_v33  ;;  %3115 = vmatprep.mubr.msk.f32.mxu0 %vm372_vm6, %v978_v43 }
 0x72f   :  { %3133 = vmatprep.subr.bf16.mxu0 %v3628_v26 }
 0x735   :  { %3116 = vmatmul.mubr.msk.f32.vlgmr.msra.gmra.mrb[10].mxu0 %vm372_vm6, %v980_v45 }
 0x736   :  { %3137 = vmatprep.mubr.msk.bf16.mxu0 %vm3629_vm4, %v3628_v26 }
 0x7cb   :  { %v3096_v46 = vpop.f32.mrb[2].mxu0 }
 0x7cc   :  { %v764_v48 = vpop.f32.mrb[3].mxu0 }
 0x7cd   :  { %v3439_v50 = vpack.i.bf16 %v3096_v46, %v764_v48 }
 0x800   :  { %v3110_v51 = vpop.f32.mrb[8].mxu0 }
 0x801   :  { %v968_v52 = vpop.f32.mrb[9].mxu0 }
 0x802   :  { %v3444_v54 = vpack.i.bf16 %v3110_v51, %v968_v52 }
 0x808   :  { %v3117_v55 = vpop.f32.mrb[10].mxu0 }
 0x809   :  { %v1069_v57 = vmul.f32 0.35355338, %v3117_v55  ;;  %v1059_v58 = vpop.f32.mrb[11].mxu0 }
 0x80a   :  { %v1068_v60 = vmul.f32 0.35355338, %v1059_v58 }
 0x80b   :  { %v1071_v61 = vadd.f32 %v1069_v57, %v3869_v56 }
 0x80c   :  { %v1070_v62 = vadd.f32 %v1068_v60, %v3874_v59 }
 0x80d   :  { %v1075_v63 = vsel %vm102_vm0, %v1071_v61, -inf }
 0x80e   :  { %1076 = vmax.xlane.f32.xlu0 %v1075_v63  ;;  %v1072_v0 = vsel %vm102_vm0, %v1070_v62, -inf }
 0x80f   :  { %1073 = vmax.xlane.f32.xlu1 %v1072_v0 }
 0x89b   :  { %v1077_v1 = vpop.xlane.xlu0 %1076 }
 0x89c   :  { %v1079_v2 = vsub.f32 %v1071_v61, %v1077_v1  ;;  %v1074_v3 = vpop.xlane.xlu1 %1073 }
 0x89d   :  { %v1078_v4 = vsub.f32 %v1070_v62, %v1074_v3 }
 0x89e   :  { %v1082_v5 = vmul.f32 1.442695, %v1079_v2 }
 0x89f   :  { %v1080_v6 = vmul.f32 1.442695, %v1078_v4 }
 0x8a0   :  { %3533 = vpow2.f32 %v1082_v5 }
 0x8a1   :  { %3535 = vpow2.f32 %v1080_v6 }
 0x8aa   :  { %v3534_v7 = vpop.eup %3533 }
 0x8ab   :  { %v3536_v8 = vpop.eup %3535  ;;  %v1087_v9 = vsel %vm102_vm0, %v3534_v7, 0.0 }
 0x8ac   :  { %1088 = vadd.xlane.f32.xlu1 %v1087_v9  ;;  %v1084_v10 = vsel %vm102_vm0, %v3536_v8, 0.0 }
 0x8ad   :  { %1085 = vadd.xlane.f32.xlu0 %v1084_v10  ;;  %v284_v10 = vld [vmem:[%s4422_s11 + $0x10] sm:$0xff] }
 0x8bd   :  { %3440 = vrot.lane.b32.xlu1 %v3439_v50, %s4440_s28  ;;  %s4449_s28 = smov 24  }
 0x8c1   :  { %3445 = vrot.lane.b32.xlu1 %v3444_v54, %s4442_s29  ;;  %s4478_s29 = smov 24  }
 0x8c3   :  { %3435 = vrot.lane.b32.xlu0 %v3850_v49, %s4443_s26  ;;  %v275_v49 = vld [vmem:[%s4418_s7] sm:$0xff]  ;;  %s4472_s26 = smov 72  }
 0x8c4   :  { %v279_v22 = vpack.c.bf16 %v276_v21, %v275_v49 }
 0x939   :  { %v1089_v11 = vpop.xlane.xlu1 %1088 }
 0x93a   :  { %3537 = vrcp.f32 %v1089_v11  ;;  %v1086_v12 = vpop.xlane.xlu0 %1085  ;;  %v285_v11 = vld [vmem:[%s4422_s11 + $0x18] sm:$0xff] }
 0x93b   :  { %3539 = vrcp.f32 %v1086_v12  ;;  %v287_v12 = vpack.c.bf16 %v285_v11, %v284_v10 }
 0x93d   :  { %v3441_v29 = vpop.permute.xlu1 %3440 }
 0x93e   :  { %v3436_v13 = vpop.permute.xlu0 %3435  ;;  %v3443_v31 = vunpack.i.h.bf16 %v3441_v29  ;;  %v3442_v32 = vunpack.i.l.bf16 %v3441_v29 }
 0x93f   :  { %v3438_v14 = vunpack.i.h.bf16 %v3436_v13  ;;  %v3437_v15 = vunpack.i.l.bf16 %v3436_v13  ;;  %v289_v13 = vld [vmem:[%s4424_s13] sm:$0xff] }
 0x940   :  { %v1206_v37 = vsel %vm372_vm6, %v3910_v34, %v3443_v31  ;;  %v1205_v38 = vsel %vm372_vm6, %v3912_v35, %v3442_v32  ;;  %v2822_v34 = vld [vmem:[%s4419_s8] ss:$0 sm:$0xff] }
 0x941   :  { %v3333_v16 = vpack.c.bf16 %v3438_v14, %v3437_v15  ;;  %v3446_v30 = vpop.permute.xlu1 %3445  ;;  %v290_v14 = vld [vmem:[%s4424_s13 + $0x8] sm:$0xff]  ;;  %v291_v15 = vld [vmem:[%s4424_s13 + $0x10] sm:$0xff] }
 0x942   :  { %v3448_v44 = vunpack.i.h.bf16 %v3446_v30  ;;  %v3447_v33 = vunpack.i.l.bf16 %v3446_v30  ;;  %v2825_v30 = vld [vmem:[%s4421_s10] ss:$0 sm:$0xff] }
 0x943   :  { %3334 = vmatprep.subr.bf16.mxu1 %v3333_v16 }
 0x944   :  { %v3538_v17 = vpop.eup %3537  ;;  %3336 = vmatpush3.bf16.msra.mxu1 %v3333_v16  ;;  %v1207_v43 = vsel %vm102_vm0, %v1205_v38, %v3447_v33  ;;  %v1208_v45 = vsel %vm102_vm0, %v1206_v37, %v3448_v44  ;;  %v305_v16 = vpack.c.bf16 %v290_v14, %v289_v13  ;;  %v294_v37 = vld [vmem:[%s4424_s13 + $0x28] sm:$0xff] }
 0x945   :  { %v3540_v18 = vpop.eup %3539  ;;  %3125 = vmatprep.subr.bf16.mxu1 %v3628_v26  ;;  %v1093_v20 = vmul.f32 %v3538_v17, %v3534_v7  ;;  %v292_v17 = vld [vmem:[%s4424_s13 + $0x18] sm:$0xff] }
 0x946   :  { %v1092_v19 = vmul.f32 %v3540_v18, %v3536_v8  ;;  %v283_v8 = vld [vmem:[%s4422_s11 + $0x8] sm:$0xff]  ;;  %v306_v18 = vpack.c.bf16 %v292_v17, %v291_v15 }
 0x948   :  { %3122 = vmatprep.mubr.msk.f32.mxu1 %vm102_vm0, %v1092_v19 }
 0x949   :  { %3123 = vmatmul.mubr.msk.f32.vlgmr.msra.gmra.mrb[8].mxu1 %vm102_vm0, %v1093_v20 }
 0x94a   :  { %3129 = vmatprep.mubr.msk.bf16.mxu1 %vm3629_vm4, %v3628_v26  ;;  %3126 = vmatpush3.bf16.msra.mxu1 %v279_v22 }
 0x94b   :  { %3127 = vmatprep.subr.bf16.mxu1 %v3628_v26 }
 0x94e   :  { %3128 = vmatpush3.bf16.msra.mxu1 %v280_v25  ;;  %v2824_v25 = vld [vmem:[%s4420_s9] ss:$0 sm:$0xff] }
 0x94f   :  { %3141 = vmatprep.subr.bf16.mxu1 %v3628_v26 }
 0xa1c   :  { %v3124_v27 = vpop.f32.mrb[8].mxu1 }
 0xa1d   :  { %v1172_v28 = vpop.f32.mrb[9].mxu1 }
 0xa1e   :  { %v3449_v47 = vpack.i.bf16 %v3124_v27, %v1172_v28 }
 0xa20   :  { %3450 = vrot.lane.b32.xlu0 %v3449_v47, %s4449_s28  ;;  %s4474_s28 = smov 104  }
 0xa92   :  { %v3451_v36 = vpop.permute.xlu0 %3450 }
 0xa93   :  { %v3453_v41 = vunpack.i.h.bf16 %v3451_v36  ;;  %v3452_v42 = vunpack.i.l.bf16 %v3451_v36  ;;  %v293_v36 = vld [vmem:[%s4424_s13 + $0x20] sm:$0xff] }
 0xa94   :  { %v307_v38 = vpack.c.bf16 %v294_v37, %v293_v36  ;;  %v2833_v36 = vld [vmem:[%s4464_s22 + $0x30] sm:$0xff]  ;;  %v2834_v37 = vld [vmem:[%s4464_s22 + $0x38] sm:$0xff] }
 0xa95   :  { %v1210_v46 = vsel %vm1209_vm8, %v1207_v43, %v3452_v42  ;;  %v1211_v48 = vsel %vm1209_vm8, %v1208_v45, %v3453_v41  ;;  %v295_v41 = vld [vmem:[%s4424_s13 + $0x30] sm:$0xff]  ;;  %v296_v42 = vld [vmem:[%s4424_s13 + $0x38] sm:$0xff]  ;;  %v297_v45 = vld [vmem:[%s4424_s13 + $0x40] sm:$0xff] }
 0xa96   :  { %v1212_v50 = vpack.c.bf16 %v1211_v48, %v1210_v46  ;;  %v308_v43 = vpack.c.bf16 %v296_v42, %v295_v41  ;;  %v298_v46 = vld [vmem:[%s4424_s13 + $0x48] sm:$0xff] }
 0xa97   :  { %v309_v48 = vpack.c.bf16 %v298_v46, %v297_v45 }
 0xa98   :  { %3130 = vmatmul.mubr.msk.bf16.vlgmr.msra.gmra.mrb[12].mxu1 %vm321_vm5, %v1212_v50  ;;  %v299_v50 = vld [vmem:[%s4424_s13 + $0x50] sm:$0xff] }
 0xa99   :  { %3157 = vmatprep.mubr.msk.bf16.mxu1 %vm3629_vm4, %v3628_v26  ;;  %3142 = vmatpush3.bf16.msra.mxu1 %v305_v16 }
 0xa9a   :  { %3143 = vmatprep.subr.bf16.mxu1 %v3628_v26 }
 0xa9d   :  { %3144 = vmatpush3.bf16.msra.mxu1 %v306_v18 }
 0xa9e   :  { %3145 = vmatprep.subr.bf16.mxu1 %v3628_v26 }
 0xaa1   :  { %3146 = vmatpush3.bf16.msra.mxu1 %v307_v38  ;;  %v1471_v38 = vpack.c.bf16 %v2834_v37, %v2833_v36 }
 0xaa2   :  { %3147 = vmatprep.subr.bf16.mxu1 %v3628_v26 }
 0xaa5   :  { %3148 = vmatpush3.bf16.msra.mxu1 %v308_v43 }
 0xaa6   :  { %3149 = vmatprep.subr.bf16.mxu1 %v3628_v26 }
 0xaa9   :  { %3150 = vmatpush3.bf16.msra.mxu1 %v309_v48 }
 0xaaa   :  { %3151 = vmatprep.subr.bf16.mxu1 %v3628_v26 }
 0xb6b   :  { %v1256_v35 = vpop.f32.mrb[12].mxu1 }
 0xb6c   :  { %v1257_v51 = vadd.f32 %v2822_v34, %v1256_v35  ;;  %v3131_v52 = vpop.f32.mrb[13].mxu1 }
 0xb6d   :  { %v1259_v54 = vpop.f32.mrb[14].mxu1  ;;  %v302_v52 = vld [vmem:[%s4424_s13 + $0x68] sm:$0xff] }
 0xb6e   :  { %v1260_v55 = vadd.f32 %v2822_v34, %v1259_v54  ;;  %v3132_v57 = vpop.f32.mrb[15].mxu1  ;;  %v1263_v58 = vadd.f32 %v1257_v51, %v3834_v40  ;;  %v300_v34 = vld [vmem:[%s4424_s13 + $0x58] sm:$0xff]  ;;  %v301_v51 = vld [vmem:[%s4424_s13 + $0x60] sm:$0xff] }
 0xb6f   :  { %v310_v35 = vpack.c.bf16 %v300_v34, %v299_v50  ;;  %v311_v54 = vpack.c.bf16 %v302_v52, %v301_v51  ;;  %v304_v57 = vld [vmem:[%s4424_s13 + $0x78] sm:$0xff]  ;;  %v2829_v34 = vld [vmem:[%s4426_s15] ss:$0 sm:$0xff] }
 0xb70   :  { %v1267_v60 = vsel %vm321_vm5, %v1263_v58, 0.0  ;;  %v1264_v61 = vadd.f32 %v3832_v39, %v1260_v55  ;;  %v282_v39 = vld [vmem:[%s4422_s11] sm:$0xff]  ;;  %v303_v55 = vld [vmem:[%s4424_s13 + $0x70] sm:$0xff] }
 0xb71   :  { %1268 = vadd.xlane.f32.xlu1 %v1267_v60  ;;  %v286_v9 = vpack.c.bf16 %v283_v8, %v282_v39  ;;  %3152 = vmatpush3.bf16.msra.mxu1 %v310_v35  ;;  %v2826_v60 = vld [vmem:[%s4423_s12] ss:$0 sm:$0xff] }
 0xb72   :  { %v1270_v62 = vsel %vm321_vm5, %v1264_v61, 0.0  ;;  %3153 = vmatprep.subr.bf16.mxu1 %v3628_v26 }
 0xb73   :  { %1271 = vadd.xlane.f32.xlu0 %v1270_v62  ;;  %3134 = vmatpush3.bf16.msra.mxu0 %v286_v9 }
 0xb74   :  { %3135 = vmatprep.subr.bf16.mxu0 %v3628_v26 }
 0xb75   :  { %3154 = vmatpush3.bf16.msra.mxu1 %v311_v54 }
 0xb76   :  { %3155 = vmatprep.subr.bf16.mxu1 %v3628_v26 }
 0xb77   :  { %3136 = vmatpush3.bf16.msra.mxu0 %v287_v12  ;;  %v2828_v12 = vld [vmem:[%s4425_s14] ss:$0 sm:$0xff] }
 0xb78   :  { %3161 = vmatprep.subr.bf16.mxu0 %v3628_v26 }
 0xbfe   :  { %v1269_v63 = vpop.xlane.xlu1 %1268 }
 0xbff   :  { %v1274_v0 = vmul.f32 0.03125, %v1269_v63 }
 0xc00   :  { %v1272_v1 = vpop.xlane.xlu0 %1271 }
 0xc01   :  { %v1276_v2 = vsub.f32 %v1263_v58, %v1274_v0  ;;  %v1275_v3 = vmul.f32 0.03125, %v1272_v1  ;;  %v312_v58 = vpack.c.bf16 %v304_v57, %v303_v55  ;;  %v2830_v55 = vld [vmem:[%s4468_s25] ss:$0 sm:$0xff] }
 0xc03   :  { %v1277_v4 = vsub.f32 %v1264_v61, %v1275_v3  ;;  %v1278_v5 = vmul.f32 %v1276_v2, %v1276_v2  ;;  %3156 = vmatpush3.bf16.msra.mxu1 %v312_v58 }
 0xc05   :  { %v1280_v6 = vsel %vm321_vm5, %v1278_v5, 0.0  ;;  %v1279_v7 = vmul.f32 %v1277_v4, %v1277_v4 }
 0xc06   :  { %1281 = vadd.xlane.f32.xlu0 %v1280_v6 }
 0xc07   :  { %v1283_v40 = vsel %vm321_vm5, %v1279_v7, 0.0 }
 0xc08   :  { %1284 = vadd.xlane.f32.xlu1 %v1283_v40 }
 0xc93   :  { %v1282_v19 = vpop.xlane.xlu0 %1281 }
 0xc94   :  { %v1286_v20 = vmul.f32 0.03125, %v1282_v19 }
 0xc95   :  { %v1285_v49 = vpop.xlane.xlu1 %1284 }
 0xc96   :  { %v1288_v21 = vadd.f32 1e-05, %v1286_v20  ;;  %v1287_v22 = vmul.f32 0.03125, %v1285_v49 }
 0xc98   :  { %3541 = vrsqrt.f32 %v1288_v21  ;;  %v1289_v23 = vadd.f32 1e-05, %v1287_v22 }
 0xc9a   :  { %3543 = vrsqrt.f32 %v1289_v23 }
 0xca2   :  { %v3542_v24 = vpop.eup %3541 }
 0xca3   :  { %v1292_v27 = vmul.f32 %v3542_v24, %v1276_v2 }
 0xca4   :  { %v3544_v28 = vpop.eup %3543 }
 0xca5   :  { %v1300_v47 = vmul.f32 %v2824_v25, %v1292_v27  ;;  %v1293_v29 = vmul.f32 %v3544_v28, %v1277_v4 }
 0xca7   :  { %v1301_v31 = vmul.f32 %v2824_v25, %v1293_v29  ;;  %v1308_v32 = vadd.f32 %v2825_v30, %v1300_v47 }
 0xca9   :  { %v4033_v44 = vadd.f32 %v2825_v30, %v1301_v31 }
 0xcab   :  { %v1310_v33 = vpack.c.bf16 %v4033_v44, %v1308_v32 }
 0xcad   :  { %3138 = vmatmul.mubr.msk.bf16.vlgmr.msra.gmra.mrb[12].mxu0 %vm321_vm5, %v1310_v33 }
 0xcae   :  { %3165 = vmatprep.mubr.msk.bf16.mxu0 %vm3629_vm4, %v3628_v26 }
 0xd80   :  { %v1354_v61 = vpop.f32.mrb[12].mxu0 }
 0xd81   :  { %v1355_v62 = vadd.f32 %v2826_v60, %v1354_v61  ;;  %v3139_v63 = vpop.f32.mrb[13].mxu0 }
 0xd82   :  { %v1357_v0 = vpop.f32.mrb[14].mxu0 }
 0xd83   :  { %v1363_v1 = vmul.f32 0.70710677, %v1355_v62  ;;  %v1358_v2 = vadd.f32 %v2826_v60, %v1357_v0  ;;  %v3140_v3 = vpop.f32.mrb[15].mxu0  ;;  %v1361_v40 = vmul.f32 0.5, %v1355_v62  ;;  %v2863_v62 = vld [vmem:[%s4417_s6 + $0x1] ss:$0 sm:$0xff] }
 0xd84   :  { %s4469_s6 = smov 112  }
 0xd85   :  { %3545 = verf.f32 %v1363_v1  ;;  %v1364_v4 = vmul.f32 0.70710677, %v1358_v2  ;;  %v1362_v39 = vmul.f32 0.5, %v1358_v2 }
 0xd87   :  { %3547 = verf.f32 %v1364_v4 }
 0xd8f   :  { %v3546_v5 = vpop.eup %3545 }
 0xd90   :  { %v1367_v6 = vadd.f32 1.0, %v3546_v5 }
 0xd91   :  { %v3548_v7 = vpop.eup %3547 }
 0xd92   :  { %v1368_v8 = vadd.f32 1.0, %v3548_v7  ;;  %v1369_v9 = vmul.f32 %v1367_v6, %v1361_v40 }
 0xd94   :  { %v1370_v10 = vmul.f32 %v1368_v8, %v1362_v39 }
 0xd96   :  { %v1371_v11 = vpack.c.bf16 %v1370_v10, %v1369_v9 }
 0xd98   :  { %3158 = vmatmul.mubr.bf16.vlgmr.msra.gmra.mrb[16].mxu1 %v1371_v11 }
 0xe6b   :  { %v1412_v13 = vpop.f32.mrb[16].mxu1 }
 0xe6c   :  { %v1413_v14 = vadd.f32 %v2828_v12, %v1412_v13  ;;  %v3159_v15 = vpop.f32.mrb[17].mxu1 }
 0xe6d   :  { %v1415_v16 = vpop.f32.mrb[18].mxu1 }
 0xe6e   :  { %v1416_v17 = vadd.f32 %v2828_v12, %v1415_v16  ;;  %v3160_v18 = vpop.f32.mrb[19].mxu1  ;;  %v1419_v19 = vadd.f32 %v1413_v14, %v1308_v32  ;;  %v2831_v32 = vld [vmem:[%s4464_s22 + $0x20] sm:$0xff] }
 0xe70   :  { %v1423_v20 = vsel %vm321_vm5, %v1419_v19, 0.0  ;;  %v1420_v49 = vadd.f32 %v1416_v17, %v4033_v44  ;;  %v2832_v44 = vld [vmem:[%s4464_s22 + $0x28] sm:$0xff]  ;;  %s4477_s22 = smov 8  }
 0xe71   :  { %1424 = vadd.xlane.f32.xlu0 %v1423_v20  ;;  %v1470_v33 = vpack.c.bf16 %v2832_v44, %v2831_v32 }
 0xe72   :  { %v1426_v21 = vsel %vm321_vm5, %v1420_v49, 0.0 }
 0xe73   :  { %1427 = vadd.xlane.f32.xlu1 %v1426_v21  ;;  %3162 = vmatpush3.bf16.msra.mxu0 %v1470_v33 }
 0xe74   :  { %3163 = vmatprep.subr.bf16.mxu0 %v3628_v26 }
 0xe77   :  { %3164 = vmatpush3.bf16.msra.mxu0 %v1471_v38 }
 0xefe   :  { %v1425_v22 = vpop.xlane.xlu0 %1424 }
 0xeff   :  { %v1429_v23 = vmul.f32 0.03125, %v1425_v22 }
 0xf00   :  { %v1428_v24 = vpop.xlane.xlu1 %1427 }
 0xf01   :  { %v1431_v25 = vsub.f32 %v1419_v19, %v1429_v23  ;;  %v1430_v27 = vmul.f32 0.03125, %v1428_v24 }
 0xf03   :  { %v1432_v28 = vsub.f32 %v1420_v49, %v1430_v27  ;;  %v1433_v47 = vmul.f32 %v1431_v25, %v1431_v25 }
 0xf05   :  { %v1435_v29 = vsel %vm321_vm5, %v1433_v47, 0.0  ;;  %v1434_v30 = vmul.f32 %v1432_v28, %v1432_v28 }
 0xf06   :  { %1436 = vadd.xlane.f32.xlu0 %v1435_v29 }
 0xf07   :  { %v1438_v31 = vsel %vm321_vm5, %v1434_v30, 0.0 }
 0xf08   :  { %1439 = vadd.xlane.f32.xlu1 %v1438_v31 }
 0xf93   :  { %v1437_v41 = vpop.xlane.xlu0 %1436 }
 0xf94   :  { %v1441_v42 = vmul.f32 0.03125, %v1437_v41 }
 0xf95   :  { %v1440_v43 = vpop.xlane.xlu1 %1439 }
 0xf96   :  { %v1443_v45 = vadd.f32 1e-05, %v1441_v42  ;;  %v1442_v46 = vmul.f32 0.03125, %v1440_v43 }
 0xf98   :  { %3549 = vrsqrt.f32 %v1443_v45  ;;  %v1444_v48 = vadd.f32 1e-05, %v1442_v46 }
 0xf9a   :  { %3551 = vrsqrt.f32 %v1444_v48 }
 0xfa2   :  { %v3550_v50 = vpop.eup %3549 }
 0xfa3   :  { %v1447_v35 = vmul.f32 %v3550_v50, %v1431_v25 }
 0xfa4   :  { %v3552_v51 = vpop.eup %3551 }
 0xfa5   :  { %v1455_v52 = vmul.f32 %v2829_v34, %v1447_v35  ;;  %v1448_v54 = vmul.f32 %v3552_v51, %v1432_v28 }
 0xfa7   :  { %v1456_v57 = vmul.f32 %v2829_v34, %v1448_v54  ;;  %v4110_v58 = vadd.f32 %v2830_v55, %v1455_v52 }
 0xfa9   :  { %v4112_v60 = vadd.f32 %v2830_v55, %v1456_v57 }
 0xfab   :  { %v1519_v61 = vpack.c.bf16 %v4112_v60, %v4110_v58 }
 0xfad   :  { %3166 = vmatmul.mubr.msk.bf16.vlgmr.msra.gmra.mrb[16].mxu0 %vm321_vm5, %v1519_v61 }
0x1080   :  { %v1563_v63 = vpop.f32.mrb[16].mxu0 }
0x1081   :  { %v4120_v0 = vadd.f32 %v2863_v62, %v1563_v63  ;;  %v3167_v1 = vpop.f32.mrb[17].mxu0 }
0x1082   :  { %v1566_v2 = vpop.f32.mrb[18].mxu0  ;;  %v4179_v1 = vld [vmem:[%s4467_s0 + $0x8] sm:$0xff] }
0x1083   :  { %v4122_v3 = vadd.f32 %v2863_v62, %v1566_v2  ;;  %v3168_v4 = vpop.f32.mrb[19].mxu0  ;;  %3173 = vmatprep.mubr.msk.f32.mxu0 %vm372_vm6, %v4120_v0 }
0x1084   :  { %v4185_v4 = vld [vmem:[%s4467_s0] sm:$0xff]  ;;  %s4471_s0 = smov 48  }
0x1085   :  { %v4128_v5 = vpack.i.bf16 %v4122_v3, %v4120_v0 }
0x1087   :  { %3455 = vrot.lane.b32.xlu0 %v4128_v5, %s3630_s3  ;;  %s4470_s3 = smov 64  }
0x108b   :  { %3465 = vrot.lane.b32.xlu0 %v4128_v5, %s3631_s5 }
0x108f   :  { %1772 = vrot.lane.b32.xlu0 %v4120_v0, %s3632_s1 }
0x1093   :  { %3470 = vrot.lane.b32.xlu0 %v4128_v5, %s3634_s24 }
0x1097   :  { %1774 = vrot.lane.b32.xlu0 %v4122_v3, %s3632_s1 }
0x109b   :  { %1978 = vrot.lane.b32.xlu0 %v4122_v3, %s4469_s6 }
0x10f9   :  { %v3456_v6 = vpop.permute.xlu0 %3455 }
0x10fa   :  { %v3458_v7 = vunpack.i.h.bf16 %v3456_v6  ;;  %v3457_v40 = vunpack.i.l.bf16 %v3456_v6 }
0x10fc   :  { %v3337_v39 = vpack.c.bf16 %v3458_v7, %v3457_v40 }
0x10fd   :  { %v3466_v8 = vpop.permute.xlu0 %3465 }
0x10fe   :  { %3339 = vmatprep.subr.msk.bf16.mxu0 %vm3856_vm7, %v3337_v39  ;;  %v3468_v44 = vunpack.i.h.bf16 %v3466_v8  ;;  %v3467_v33 = vunpack.i.l.bf16 %v3466_v8 }
0x10ff   :  { %3342 = vmatpush3.bf16.xpose.msk.msra.mxu0 %vm3856_vm7, %v3337_v39 }
0x1100   :  { %v3347_v42 = vpack.c.bf16 %v3468_v44, %v3467_v33 }
0x1101   :  { %v1773_v9 = vpop.permute.xlu0 %1772 }
0x1105   :  { %v3471_v10 = vpop.permute.xlu0 %3470 }
0x1106   :  { %v3473_v11 = vunpack.i.h.bf16 %v3471_v10  ;;  %v3472_v12 = vunpack.i.l.bf16 %v3471_v10  ;;  %3174 = vmatmul.mubr.msk.f32.vlgmr.msra.gmra.mrb[20].mxu0 %vm372_vm6, %v4122_v3 }
0x1108   :  { %v3357_v13 = vpack.c.bf16 %v3473_v11, %v3472_v12 }
0x1109   :  { %v1775_v31 = vpop.permute.xlu0 %1774 }
0x110a   :  { %3359 = vmatprep.subr.msk.bf16.mxu1 %vm3856_vm7, %v3357_v13 }
0x110b   :  { %3362 = vmatpush3.bf16.xpose.msk.msra.mxu1 %vm3856_vm7, %v3357_v13 }
0x110d   :  { %v1979_v43 = vpop.permute.xlu0 %1978 }
0x11d9   :  { %v3175_v14 = vpop.f32.mrb[20].mxu0 }
0x11da   :  { %v1650_v15 = vpop.f32.mrb[21].mxu0  ;;  %v1660_v16 = vmul.f32 0.35355338, %v3175_v14 }
0x11db   :  { %v1659_v17 = vmul.f32 0.35355338, %v1650_v15 }
0x11dc   :  { %v1662_v20 = vadd.f32 %v1660_v16, %v3869_v56 }
0x11dd   :  { %v1661_v18 = vadd.f32 %v1659_v17, %v3874_v59 }
0x11de   :  { %v1666_v49 = vsel %vm102_vm0, %v1662_v20, -inf }
0x11df   :  { %v1663_v19 = vsel %vm102_vm0, %v1661_v18, -inf }
0x11e0   :  { %1664 = vmax.xlane.f32.xlu1 %v1663_v19 }
0x11e4   :  { %1667 = vmax.xlane.f32.xlu1 %v1666_v49 }
0x126d   :  { %v1665_v21 = vpop.xlane.xlu1 %1664 }
0x126e   :  { %v1669_v22 = vsub.f32 %v1661_v18, %v1665_v21 }
0x1270   :  { %v1671_v25 = vmul.f32 1.442695, %v1669_v22 }
0x1271   :  { %v1668_v23 = vpop.xlane.xlu1 %1667 }
0x1272   :  { %v1670_v24 = vsub.f32 %v1662_v20, %v1668_v23 }
0x1274   :  { %v1673_v27 = vmul.f32 1.442695, %v1670_v24 }
0x1276   :  { %3553 = vpow2.f32 %v1673_v27 }
0x1277   :  { %3555 = vpow2.f32 %v1671_v25 }
0x1280   :  { %v3554_v28 = vpop.eup %3553 }
0x1281   :  { %v1678_v47 = vsel %vm102_vm0, %v3554_v28, 0.0  ;;  %v3556_v59 = vpop.eup %3555 }
0x1282   :  { %1679 = vadd.xlane.f32.xlu1 %v1678_v47  ;;  %v1675_v29 = vsel %vm102_vm0, %v3556_v59, 0.0 }
0x1286   :  { %1676 = vadd.xlane.f32.xlu1 %v1675_v29 }
0x1297   :  { %3460 = vrot.lane.b32.xlu1 %v4128_v5, %s4470_s3 }
0x129b   :  { %1976 = vrot.lane.b32.xlu1 %v4120_v0, %s4469_s6 }
0x130f   :  { %v1680_v56 = vpop.xlane.xlu1 %1679 }
0x1310   :  { %3557 = vrcp.f32 %v1680_v56 }
0x1313   :  { %v1677_v30 = vpop.xlane.xlu1 %1676 }
0x1314   :  { %3559 = vrcp.f32 %v1677_v30 }
0x1317   :  { %v3461_v32 = vpop.permute.xlu1 %3460 }
0x1318   :  { %v3463_v36 = vunpack.i.h.bf16 %v3461_v32  ;;  %v3462_v37 = vunpack.i.l.bf16 %v3461_v32 }
0x131a   :  { %v3343_v38 = vpack.c.bf16 %v3463_v36, %v3462_v37  ;;  %v3558_v45 = vpop.eup %3557 }
0x131b   :  { %v1977_v41 = vpop.permute.xlu1 %1976  ;;  %v1684_v50 = vmul.f32 %v3558_v45, %v3554_v28 }
0x131c   :  { %3344 = vmatprep.subr.bf16.mxu0 %v3343_v38  ;;  %3201 = vmatprep.mubr.msk.f32.mxu1 %vm372_vm6, %v1977_v41 }
0x131d   :  { %3346 = vmatpush3.bf16.msra.mxu0 %v3343_v38  ;;  %3202 = vmatmul.mubr.msk.f32.vlgmr.msra.gmra.mrb[10].mxu1 %vm372_vm6, %v1979_v43 }
0x131e   :  { %v3560_v46 = vpop.eup %3559  ;;  %3349 = vmatprep.subr.msk.bf16.mxu0 %vm3856_vm7, %v3347_v42 }
0x131f   :  { %v1683_v48 = vmul.f32 %v3560_v46, %v3556_v59 }
0x1321   :  { %3180 = vmatprep.mubr.msk.f32.mxu0 %vm102_vm0, %v1683_v48 }
0x1322   :  { %3181 = vmatmul.mubr.msk.f32.vlgmr.msra.gmra.mrb[22].mxu0 %vm102_vm0, %v1684_v50 }
0x1323   :  { %3187 = vmatprep.mubr.msk.f32.mxu0 %vm372_vm6, %v1773_v9 }
0x1326   :  { %3352 = vmatpush3.bf16.xpose.msk.msra.mxu0 %vm3856_vm7, %v3347_v42 }
0x132d   :  { %3188 = vmatmul.mubr.msk.f32.vlgmr.msra.gmra.mrb[24].mxu0 %vm372_vm6, %v1775_v31 }
0x13f0   :  { %v3203_v34 = vpop.f32.mrb[10].mxu1 }
0x13f1   :  { %v2058_v35 = vpop.f32.mrb[11].mxu1  ;;  %v2068_v62 = vmul.f32 0.35355338, %v3203_v34 }
0x13f2   :  { %v2067_v55 = vmul.f32 0.35355338, %v2058_v35 }
0x13f3   :  { %v2070_v8 = vadd.f32 %v4179_v1, %v2068_v62 }
0x13f4   :  { %v2069_v40 = vadd.f32 %v4185_v4, %v2067_v55 }
0x13f5   :  { %v4172_v51 = vpop.f32.mrb[22].mxu0  ;;  %v2074_v10 = vsel %vm102_vm0, %v2070_v8, -inf }
0x13f6   :  { %v4174_v52 = vpop.f32.mrb[23].mxu0  ;;  %v2071_v9 = vsel %vm102_vm0, %v2069_v40, -inf }
0x1400   :  { %v3189_v54 = vpop.f32.mrb[24].mxu0 }
0x1401   :  { %v1864_v57 = vmul.f32 0.35355338, %v3189_v54  ;;  %v1854_v61 = vpop.f32.mrb[25].mxu0 }
0x1402   :  { %v1863_v63 = vmul.f32 0.35355338, %v1854_v61 }
0x1403   :  { %v1866_v2 = vadd.f32 %v4179_v1, %v1864_v57 }
0x1404   :  { %v1865_v6 = vadd.f32 %v4185_v4, %v1863_v63 }
0x1405   :  { %v1870_v7 = vsel %vm102_vm0, %v1866_v2, -inf }
0x1406   :  { %1871 = vmax.xlane.f32.xlu0 %v1870_v7  ;;  %v1867_v39 = vsel %vm102_vm0, %v1865_v6, -inf }
0x1407   :  { %1868 = vmax.xlane.f32.xlu1 %v1867_v39 }
0x140a   :  { %2072 = vmax.xlane.f32.xlu0 %v2071_v9 }
0x140b   :  { %2075 = vmax.xlane.f32.xlu1 %v2074_v10 }
0x1493   :  { %v1872_v11 = vpop.xlane.xlu0 %1871 }
0x1494   :  { %v1869_v12 = vpop.xlane.xlu1 %1868  ;;  %v1874_v14 = vsub.f32 %v1866_v2, %v1872_v11 }
0x1495   :  { %v1873_v13 = vsub.f32 %v1865_v6, %v1869_v12 }
0x1496   :  { %v1877_v49 = vmul.f32 1.442695, %v1874_v14 }
0x1497   :  { %v2073_v15 = vpop.xlane.xlu0 %2072  ;;  %v1875_v19 = vmul.f32 1.442695, %v1873_v13 }
0x1498   :  { %v2077_v16 = vsub.f32 %v2069_v40, %v2073_v15  ;;  %v2076_v17 = vpop.xlane.xlu1 %2075 }
0x1499   :  { %v2078_v18 = vsub.f32 %v2070_v8, %v2076_v17 }
0x149a   :  { %v2079_v20 = vmul.f32 1.442695, %v2077_v16 }
0x149b   :  { %v2081_v21 = vmul.f32 1.442695, %v2078_v18 }
0x149c   :  { %3561 = vpow2.f32 %v2079_v20 }
0x149d   :  { %3563 = vpow2.f32 %v2081_v21 }
0x149e   :  { %3565 = vpow2.f32 %v1875_v19 }
0x149f   :  { %3567 = vpow2.f32 %v1877_v49 }
0x14a6   :  { %v3562_v22 = vpop.eup %3561 }
0x14a7   :  { %v3564_v23 = vpop.eup %3563  ;;  %v2083_v24 = vsel %vm102_vm0, %v3562_v22, 0.0 }
0x14a8   :  { %v3566_v25 = vpop.eup %3565  ;;  %2084 = vadd.xlane.f32.xlu0 %v2083_v24  ;;  %v2086_v27 = vsel %vm102_vm0, %v3564_v23, 0.0 }
0x14a9   :  { %v3568_v28 = vpop.eup %3567  ;;  %2087 = vadd.xlane.f32.xlu1 %v2086_v27  ;;  %v1879_v47 = vsel %vm102_vm0, %v3566_v25, 0.0 }
0x14aa   :  { %v1882_v59 = vsel %vm102_vm0, %v3568_v28, 0.0 }
0x14ac   :  { %1880 = vadd.xlane.f32.xlu0 %v1879_v47 }
0x14ad   :  { %1883 = vadd.xlane.f32.xlu1 %v1882_v59 }
0x14be   :  { %3480 = vrot.lane.b32.xlu1 %v4128_v5, %s4471_s0 }
0x14c2   :  { %3485 = vrot.lane.b32.xlu1 %v4128_v5, %s4472_s26  ;;  %3475 = vrot.lane.b32.xlu0 %v4128_v5, %s4473_s4 }
0x14c6   :  { %2182 = vrot.lane.b32.xlu1 %v4122_v3, %s4474_s28  ;;  %2180 = vrot.lane.b32.xlu0 %v4120_v0, %s4474_s28 }
0x1535   :  { %v2085_v29 = vpop.xlane.xlu0 %2084 }
0x1536   :  { %v2088_v56 = vpop.xlane.xlu1 %2087  ;;  %3569 = vrcp.f32 %v2085_v29 }
0x1539   :  { %v1881_v30 = vpop.xlane.xlu0 %1880 }
0x153a   :  { %3571 = vrcp.f32 %v1881_v30  ;;  %v1884_v31 = vpop.xlane.xlu1 %1883  ;;  %v2837_v30 = vld [vmem:[%s4418_s7 + $0x28] sm:$0xff] }
0x153b   :  { %3573 = vrcp.f32 %v1884_v31 }
0x153c   :  { %3575 = vrcp.f32 %v2088_v56  ;;  %v2836_v56 = vld [vmem:[%s4418_s7 + $0x20] sm:$0xff] }
0x153d   :  { %v3476_v32 = vpop.permute.xlu0 %3475  ;;  %v1479_v31 = vpack.c.bf16 %v2837_v30, %v2836_v56 }
0x153e   :  { %v3478_v44 = vunpack.i.h.bf16 %v3476_v32  ;;  %v3477_v33 = vunpack.i.l.bf16 %v3476_v32  ;;  %v3481_v36 = vpop.permute.xlu1 %3480  ;;  %v2838_v32 = vld [vmem:[%s4418_s7 + $0x30] sm:$0xff] }
0x153f   :  { %v3483_v37 = vunpack.i.h.bf16 %v3481_v36  ;;  %v3482_v38 = vunpack.i.l.bf16 %v3481_v36 }
0x1540   :  { %v3353_v41 = vpack.c.bf16 %v3478_v44, %v3477_v33  ;;  %v3570_v43 = vpop.eup %3569  ;;  %v2839_v44 = vld [vmem:[%s4418_s7 + $0x38] sm:$0xff] }
0x1541   :  { %v3363_v42 = vpack.c.bf16 %v3483_v37, %v3482_v38  ;;  %v2091_v54 = vmul.f32 %v3570_v43, %v3562_v22  ;;  %v2181_v61 = vpop.permute.xlu0 %2180  ;;  %v1480_v33 = vpack.c.bf16 %v2839_v44, %v2838_v32  ;;  %v2893_v32 = vld [vmem:[%s4420_s9 + $0x1] ss:$0 sm:$0xff] }
0x1542   :  { %v3486_v3 = vpop.permute.xlu1 %3485  ;;  %3354 = vmatprep.subr.bf16.mxu0 %v3353_v41 }
0x1543   :  { %3356 = vmatpush3.bf16.msra.mxu0 %v3353_v41  ;;  %v3488_v45 = vunpack.i.h.bf16 %v3486_v3  ;;  %v3487_v46 = vunpack.i.l.bf16 %v3486_v3 }
0x1544   :  { %v3572_v0 = vpop.eup %3571  ;;  %3364 = vmatprep.subr.bf16.mxu0 %v3363_v42 }
0x1545   :  { %v3574_v48 = vpop.eup %3573  ;;  %v1887_v50 = vmul.f32 %v3572_v0, %v3566_v25  ;;  %v3367_v55 = vpack.c.bf16 %v3488_v45, %v3487_v46 }
0x1546   :  { %v1888_v34 = vmul.f32 %v3574_v48, %v3568_v28  ;;  %v3576_v35 = vpop.eup %3575  ;;  %v2183_v62 = vpop.permute.xlu1 %2182 }
0x1547   :  { %3194 = vmatprep.mubr.msk.f32.mxu0 %vm102_vm0, %v1887_v50  ;;  %v2092_v57 = vmul.f32 %v3576_v35, %v3564_v23 }
0x1548   :  { %3195 = vmatmul.mubr.msk.f32.vlgmr.msra.gmra.mrb[26].mxu0 %vm102_vm0, %v1888_v34 }
0x1549   :  { %3366 = vmatpush3.bf16.msra.mxu0 %v3363_v42  ;;  %3208 = vmatprep.mubr.msk.f32.mxu0 %vm102_vm0, %v2091_v54 }
0x154a   :  { %3369 = vmatprep.subr.msk.bf16.mxu0 %vm3856_vm7, %v3367_v55 }
0x154c   :  { %3209 = vmatmul.mubr.msk.f32.vlgmr.msra.gmra.mrb[28].mxu0 %vm102_vm0, %v2092_v57 }
0x154d   :  { %3215 = vmatprep.mubr.msk.f32.mxu0 %vm372_vm6, %v2181_v61 }
0x1552   :  { %3372 = vmatpush3.bf16.xpose.msk.msra.mxu0 %vm3856_vm7, %v3367_v55 }
0x1553   :  { %3233 = vmatprep.subr.bf16.mxu0 %v3628_v26 }
0x1559   :  { %3216 = vmatmul.mubr.msk.f32.vlgmr.msra.gmra.mrb[30].mxu0 %vm372_vm6, %v2183_v62 }
0x155a   :  { %3237 = vmatprep.mubr.msk.bf16.mxu0 %vm3629_vm4, %v3628_v26 }
0x161b   :  { %v3196_v63 = vpop.f32.mrb[26].mxu0 }
0x161c   :  { %v1967_v2 = vpop.f32.mrb[27].mxu0 }
0x161d   :  { %v3494_v6 = vpack.i.bf16 %v3196_v63, %v1967_v2 }
0x161f   :  { %v3210_v7 = vpop.f32.mrb[28].mxu0 }
0x1620   :  { %v2171_v40 = vpop.f32.mrb[29].mxu0 }
0x1621   :  { %v3499_v39 = vpack.i.bf16 %v3210_v7, %v2171_v40 }
0x162c   :  { %v3217_v8 = vpop.f32.mrb[30].mxu0 }
0x162d   :  { %v2272_v9 = vmul.f32 0.35355338, %v3217_v8  ;;  %v2262_v10 = vpop.f32.mrb[31].mxu0 }
0x162e   :  { %v2271_v11 = vmul.f32 0.35355338, %v2262_v10 }
0x162f   :  { %v2274_v53 = vadd.f32 %v4179_v1, %v2272_v9 }
0x1630   :  { %v2273_v12 = vadd.f32 %v4185_v4, %v2271_v11 }
0x1631   :  { %v2278_v13 = vsel %vm102_vm0, %v2274_v53, -inf }
0x1632   :  { %2279 = vmax.xlane.f32.xlu1 %v2278_v13  ;;  %v2275_v14 = vsel %vm102_vm0, %v2273_v12, -inf }
0x1633   :  { %2276 = vmax.xlane.f32.xlu0 %v2275_v14 }
0x1643   :  { %3490 = vrot.lane.b32.xlu1 %v4128_v5, %s4475_s23 }
0x1647   :  { %3500 = vrot.lane.b32.xlu1 %v3499_v39, %s4476_s30 }
0x16bf   :  { %v2280_v15 = vpop.xlane.xlu1 %2279 }
0x16c0   :  { %v2282_v16 = vsub.f32 %v2274_v53, %v2280_v15  ;;  %v2277_v17 = vpop.xlane.xlu0 %2276 }
0x16c1   :  { %v2281_v18 = vsub.f32 %v2273_v12, %v2277_v17 }
0x16c2   :  { %v2285_v19 = vmul.f32 1.442695, %v2282_v16 }
0x16c3   :  { %v2283_v20 = vmul.f32 1.442695, %v2281_v18  ;;  %v3491_v1 = vpop.permute.xlu1 %3490 }
0x16c4   :  { %v3493_v49 = vunpack.i.h.bf16 %v3491_v1  ;;  %v3492_v4 = vunpack.i.l.bf16 %v3491_v1  ;;  %v2843_v1 = vld [vmem:[%s4422_s11 + $0x30] sm:$0xff] }
0x16c5   :  { %3577 = vpow2.f32 %v2283_v20 }
0x16c6   :  { %v3373_v21 = vpack.c.bf16 %v3493_v49, %v3492_v4  ;;  %3579 = vpow2.f32 %v2285_v19  ;;  %v2842_v19 = vld [vmem:[%s4422_s11 + $0x28] sm:$0xff]  ;;  %v2844_v49 = vld [vmem:[%s4422_s11 + $0x38] sm:$0xff] }
0x16c7   :  { %v3501_v43 = vpop.permute.xlu1 %3500  ;;  %v1489_v4 = vpack.c.bf16 %v2844_v49, %v2843_v1 }
0x16c8   :  { %3374 = vmatprep.subr.bf16.mxu1 %v3373_v21  ;;  %v3503_v46 = vunpack.i.h.bf16 %v3501_v43  ;;  %v3502_v48 = vunpack.i.l.bf16 %v3501_v43  ;;  %v2850_v43 = vld [vmem:[%s4424_s13 + $0xa0] sm:$0xff] }
0x16c9   :  { %3376 = vmatpush3.bf16.msra.mxu1 %v3373_v21  ;;  %v2846_v21 = vld [vmem:[%s4424_s13 + $0x80] sm:$0xff] }
0x16ca   :  { %3225 = vmatprep.subr.bf16.mxu1 %v3628_v26 }
0x16cf   :  { %v3578_v22 = vpop.eup %3577 }
0x16d0   :  { %v2287_v5 = vsel %vm102_vm0, %v3578_v22, 0.0  ;;  %v3580_v23 = vpop.eup %3579 }
0x16d1   :  { %2288 = vadd.xlane.f32.xlu0 %v2287_v5  ;;  %v2290_v24 = vsel %vm102_vm0, %v3580_v23, 0.0  ;;  %v2848_v5 = vld [vmem:[%s4424_s13 + $0x90] sm:$0xff] }
0x16d5   :  { %2291 = vadd.xlane.f32.xlu0 %v2290_v24  ;;  %v2849_v24 = vld [vmem:[%s4424_s13 + $0x98] sm:$0xff] }
0x16eb   :  { %3495 = vrot.lane.b32.xlu0 %v3494_v6, %s4477_s22 }
0x175e   :  { %v2289_v25 = vpop.xlane.xlu0 %2288 }
0x175f   :  { %3581 = vrcp.f32 %v2289_v25  ;;  %v1510_v25 = vpack.c.bf16 %v2849_v24, %v2848_v5 }
0x1762   :  { %v2292_v27 = vpop.xlane.xlu0 %2291 }
0x1763   :  { %3583 = vrcp.f32 %v2292_v27 }
0x1766   :  { %v3496_v41 = vpop.permute.xlu0 %3495 }
0x1767   :  { %v3498_v42 = vunpack.i.h.bf16 %v3496_v41  ;;  %v3497_v3 = vunpack.i.l.bf16 %v3496_v41 }
0x1769   :  { %v3582_v28 = vpop.eup %3581  ;;  %v2409_v0 = vsel %vm372_vm6, %v4172_v51, %v3498_v42  ;;  %v2408_v45 = vsel %vm372_vm6, %v4174_v52, %v3497_v3  ;;  %v2889_v51 = vld [vmem:[%s4419_s8 + $0x1] ss:$0 sm:$0xff] }
0x176a   :  { %v2295_v47 = vmul.f32 %v3582_v28, %v3578_v22  ;;  %v2410_v54 = vsel %vm102_vm0, %v2408_v45, %v3502_v48  ;;  %v2411_v55 = vsel %vm102_vm0, %v2409_v0, %v3503_v46  ;;  %v2847_v22 = vld [vmem:[%s4424_s13 + $0x88] sm:$0xff]  ;;  %v2852_v46 = vld [vmem:[%s4424_s13 + $0xb0] sm:$0xff]  ;;  %v2853_v48 = vld [vmem:[%s4424_s13 + $0xb8] sm:$0xff] }
0x176b   :  { %v2851_v0 = vld [vmem:[%s4424_s13 + $0xa8] sm:$0xff] }
0x176c   :  { %3222 = vmatprep.mubr.msk.f32.mxu1 %vm102_vm0, %v2295_v47  ;;  %v1511_v45 = vpack.c.bf16 %v2851_v0, %v2850_v43  ;;  %v2900_v0 = vld [vmem:[%s4426_s15 + $0x1] ss:$0 sm:$0xff] }
0x176d   :  { %v3584_v59 = vpop.eup %3583 }
0x176e   :  { %v2296_v29 = vmul.f32 %v3584_v59, %v3580_v23  ;;  %v1509_v23 = vpack.c.bf16 %v2847_v22, %v2846_v21 }
0x1770   :  { %3223 = vmatmul.mubr.msk.f32.vlgmr.msra.gmra.mrb[20].mxu1 %vm102_vm0, %v2296_v29 }
0x1771   :  { %3229 = vmatprep.mubr.msk.bf16.mxu1 %vm3629_vm4, %v3628_v26  ;;  %3226 = vmatpush3.bf16.msra.mxu1 %v1479_v31 }
0x1772   :  { %3227 = vmatprep.subr.bf16.mxu1 %v3628_v26 }
0x1775   :  { %3228 = vmatpush3.bf16.msra.mxu1 %v1480_v33 }
0x1776   :  { %3241 = vmatprep.subr.bf16.mxu1 %v3628_v26 }
0x1843   :  { %v3224_v36 = vpop.f32.mrb[20].mxu1 }
0x1844   :  { %v2375_v37 = vpop.f32.mrb[21].mxu1 }
0x1845   :  { %v3504_v38 = vpack.i.bf16 %v3224_v36, %v2375_v37  ;;  %v2894_v37 = vld [vmem:[%s4421_s10 + $0x1] ss:$0 sm:$0xff] }
0x1847   :  { %3505 = vrot.lane.b32.xlu1 %v3504_v38, %s4478_s29 }
0x18b9   :  { %v3506_v50 = vpop.permute.xlu1 %3505 }
0x18ba   :  { %v3508_v34 = vunpack.i.h.bf16 %v3506_v50  ;;  %v3507_v35 = vunpack.i.l.bf16 %v3506_v50  ;;  %v1512_v50 = vpack.c.bf16 %v2853_v48, %v2852_v46  ;;  %v2901_v48 = vld [vmem:[%s4468_s25 + $0x1] ss:$0 sm:$0xff] }
0x18bc   :  { %v2412_v57 = vsel %vm1209_vm8, %v2410_v54, %v3507_v35  ;;  %v2413_v61 = vsel %vm1209_vm8, %v2411_v55, %v3508_v34  ;;  %v2854_v34 = vld [vmem:[%s4424_s13 + $0xc0] sm:$0xff]  ;;  %v2855_v35 = vld [vmem:[%s4424_s13 + $0xc8] sm:$0xff]  ;;  %v2856_v55 = vld [vmem:[%s4424_s13 + $0xd0] sm:$0xff] }
0x18bd   :  { %v2414_v62 = vpack.c.bf16 %v2413_v61, %v2412_v57  ;;  %v1513_v54 = vpack.c.bf16 %v2855_v35, %v2854_v34  ;;  %v2857_v57 = vld [vmem:[%s4424_s13 + $0xd8] sm:$0xff] }
0x18be   :  { %v1514_v61 = vpack.c.bf16 %v2857_v57, %v2856_v55 }
0x18bf   :  { %3230 = vmatmul.mubr.msk.bf16.vlgmr.msra.gmra.mrb[24].mxu1 %vm321_vm5, %v2414_v62  ;;  %v2858_v62 = vld [vmem:[%s4424_s13 + $0xe0] sm:$0xff] }
0x18c0   :  { %3257 = vmatprep.mubr.msk.bf16.mxu1 %vm3629_vm4, %v3628_v26  ;;  %3242 = vmatpush3.bf16.msra.mxu1 %v1509_v23 }
0x18c1   :  { %3243 = vmatprep.subr.bf16.mxu1 %v3628_v26 }
0x18c4   :  { %3244 = vmatpush3.bf16.msra.mxu1 %v1510_v25 }
0x18c5   :  { %3245 = vmatprep.subr.bf16.mxu1 %v3628_v26 }
0x18c8   :  { %3246 = vmatpush3.bf16.msra.mxu1 %v1511_v45 }
0x18c9   :  { %3247 = vmatprep.subr.bf16.mxu1 %v3628_v26 }
0x18cc   :  { %3248 = vmatpush3.bf16.msra.mxu1 %v1512_v50 }
0x18cd   :  { %3249 = vmatprep.subr.bf16.mxu1 %v3628_v26 }
0x18d0   :  { %3250 = vmatpush3.bf16.msra.mxu1 %v1513_v54 }
0x18d1   :  { %3251 = vmatprep.subr.bf16.mxu1 %v3628_v26 }
0x18d4   :  { %3252 = vmatpush3.bf16.msra.mxu1 %v1514_v61 }
0x18d5   :  { %3253 = vmatprep.subr.bf16.mxu1 %v3628_v26 }
0x1992   :  { %v2458_v52 = vpop.f32.mrb[24].mxu1 }
0x1993   :  { %v2459_v63 = vadd.f32 %v2889_v51, %v2458_v52  ;;  %v3231_v2 = vpop.f32.mrb[25].mxu1 }
0x1994   :  { %v2461_v6 = vpop.f32.mrb[26].mxu1  ;;  %v2861_v2 = vld [vmem:[%s4424_s13 + $0xf8] sm:$0xff] }
0x1995   :  { %v2462_v7 = vadd.f32 %v2889_v51, %v2461_v6  ;;  %v3232_v40 = vpop.f32.mrb[27].mxu1  ;;  %v2465_v39 = vadd.f32 %v2459_v63, %v4110_v58  ;;  %v2859_v51 = vld [vmem:[%s4424_s13 + $0xe8] sm:$0xff]  ;;  %v2860_v63 = vld [vmem:[%s4424_s13 + $0xf0] sm:$0xff] }
0x1996   :  { %v1515_v52 = vpack.c.bf16 %v2859_v51, %v2858_v62  ;;  %v1516_v6 = vpack.c.bf16 %v2861_v2, %v2860_v63 }
0x1997   :  { %v2471_v8 = vsel %vm321_vm5, %v2465_v39, 0.0  ;;  %v2466_v9 = vadd.f32 %v2462_v7, %v4112_v60  ;;  %v2841_v60 = vld [vmem:[%s4422_s11 + $0x20] sm:$0xff] }
0x1998   :  { %2472 = vadd.xlane.f32.xlu0 %v2471_v8  ;;  %v1488_v20 = vpack.c.bf16 %v2842_v19, %v2841_v60  ;;  %3254 = vmatpush3.bf16.msra.mxu1 %v1515_v52  ;;  %v2895_v7 = vld [vmem:[%s4423_s12 + $0x1] ss:$0 sm:$0xff] }
0x1999   :  { %v2474_v10 = vsel %vm321_vm5, %v2466_v9, 0.0  ;;  %3255 = vmatprep.subr.bf16.mxu1 %v3628_v26 }
0x199a   :  { %2475 = vadd.xlane.f32.xlu1 %v2474_v10  ;;  %3234 = vmatpush3.bf16.msra.mxu0 %v1488_v20  ;;  %v2897_v20 = vld [vmem:[%s4425_s14 + $0x1] ss:$0 sm:$0xff] }
0x199b   :  { %3235 = vmatprep.subr.bf16.mxu0 %v3628_v26 }
0x199c   :  { %3256 = vmatpush3.bf16.msra.mxu1 %v1516_v6 }
0x199e   :  { %3236 = vmatpush3.bf16.msra.mxu0 %v1489_v4 }
0x199f   :  { %3261 = vmatprep.subr.bf16.mxu0 %v3628_v26 }
0x1a25   :  { %v2473_v11 = vpop.xlane.xlu0 %2472 }
0x1a26   :  { %v2477_v53 = vmul.f32 0.03125, %v2473_v11 }
0x1a27   :  { %v2476_v12 = vpop.xlane.xlu1 %2475 }
0x1a28   :  { %v2479_v13 = vsub.f32 %v2465_v39, %v2477_v53  ;;  %v2478_v14 = vmul.f32 0.03125, %v2476_v12 }
0x1a2a   :  { %v2480_v15 = vsub.f32 %v2466_v9, %v2478_v14  ;;  %v2481_v16 = vmul.f32 %v2479_v13, %v2479_v13 }
0x1a2c   :  { %v2483_v17 = vsel %vm321_vm5, %v2481_v16, 0.0  ;;  %v2482_v18 = vmul.f32 %v2480_v15, %v2480_v15 }
0x1a2d   :  { %2484 = vadd.xlane.f32.xlu0 %v2483_v17 }
0x1a2e   :  { %v2486_v58 = vsel %vm321_vm5, %v2482_v18, 0.0 }
0x1a31   :  { %2487 = vadd.xlane.f32.xlu0 %v2486_v58 }
0x1aba   :  { %v2485_v27 = vpop.xlane.xlu0 %2484 }
0x1abb   :  { %v2489_v28 = vmul.f32 0.03125, %v2485_v27 }
0x1abd   :  { %v2491_v47 = vadd.f32 1e-05, %v2489_v28 }
0x1abe   :  { %v2488_v59 = vpop.xlane.xlu0 %2487 }
0x1abf   :  { %3585 = vrsqrt.f32 %v2491_v47  ;;  %v2490_v29 = vmul.f32 0.03125, %v2488_v59 }
0x1ac1   :  { %v2492_v56 = vadd.f32 1e-05, %v2490_v29 }
0x1ac3   :  { %3587 = vrsqrt.f32 %v2492_v56 }
0x1ac9   :  { %v3586_v30 = vpop.eup %3585 }
0x1aca   :  { %v2495_v31 = vmul.f32 %v3586_v30, %v2479_v13 }
0x1acc   :  { %v2503_v33 = vmul.f32 %v2893_v32, %v2495_v31 }
0x1acd   :  { %v3588_v44 = vpop.eup %3587 }
0x1ace   :  { %v2496_v36 = vmul.f32 %v3588_v44, %v2480_v15  ;;  %v2511_v41 = vadd.f32 %v2894_v37, %v2503_v33 }
0x1ad0   :  { %v2504_v38 = vmul.f32 %v2893_v32, %v2496_v36 }
0x1ad2   :  { %v4305_v42 = vadd.f32 %v2894_v37, %v2504_v38 }
0x1ad4   :  { %v2513_v3 = vpack.c.bf16 %v4305_v42, %v2511_v41 }
0x1ad6   :  { %3238 = vmatmul.mubr.msk.bf16.vlgmr.msra.gmra.mrb[32].mxu0 %vm321_vm5, %v2513_v3 }
0x1ad7   :  { %3265 = vmatprep.mubr.msk.bf16.mxu0 %vm3629_vm4, %v3628_v26 }
0x1ba9   :  { %v2557_v40 = vpop.f32.mrb[32].mxu0 }
0x1baa   :  { %v2558_v39 = vadd.f32 %v2895_v7, %v2557_v40  ;;  %v3239_v8 = vpop.f32.mrb[33].mxu0 }
0x1bab   :  { %v2560_v9 = vpop.f32.mrb[34].mxu0 }
0x1bac   :  { %v2566_v10 = vmul.f32 0.70710677, %v2558_v39  ;;  %v2561_v11 = vadd.f32 %v2895_v7, %v2560_v9  ;;  %v3240_v53 = vpop.f32.mrb[35].mxu0  ;;  %v2564_v16 = vmul.f32 0.5, %v2558_v39  ;;  %v2715_v9 = vld [vmem:[%s4430_s19] sm:$0xff] }
0x1bad   :  { %v2717_v53 = vld [vmem:[%s4430_s19 + $0x10] sm:$0xff] }
0x1bae   :  { %3589 = verf.f32 %v2566_v10  ;;  %v2567_v12 = vmul.f32 0.70710677, %v2561_v11  ;;  %v2565_v17 = vmul.f32 0.5, %v2561_v11  ;;  %v2716_v10 = vld [vmem:[%s4430_s19 + $0x8] sm:$0xff] }
0x1baf   :  { %v2719_v11 = vpack.c.bf16 %v2716_v10, %v2715_v9 }
0x1bb0   :  { %3591 = verf.f32 %v2567_v12  ;;  %v2718_v12 = vld [vmem:[%s4430_s19 + $0x18] sm:$0xff] }
0x1bb1   :  { %3262 = vmatpush3.bf16.msra.mxu0 %v2719_v11 }
0x1bb2   :  { %3263 = vmatprep.subr.bf16.mxu0 %v3628_v26  ;;  %v2902_v26 = vld [vmem:[%s4428_s17] ss:$0 sm:$0xff]  ;;  %s3644_s17 = smov [#allocation2]  }
0x1bb3   :  { %s2779_s4 = sshll.u32 %s3644_s17, 4  ;;  %s2780_s4 = int_to_ptr.vmem [resolvable:$true] %s2779_s4 }
0x1bb4   :  { %p3608_p1 = scmp.lt.s32.totalorder %s2780_s4, %s2780_s4 }
0x1bb8   :  { %v3590_v13 = vpop.eup %3589 }
0x1bb9   :  { %v2570_v14 = vadd.f32 1.0, %v3590_v13  ;;  %v2720_v13 = vpack.c.bf16 %v2718_v12, %v2717_v53 }
0x1bba   :  { %v3592_v15 = vpop.eup %3591 }
0x1bbb   :  { %v2571_v18 = vadd.f32 1.0, %v3592_v15  ;;  %v2572_v58 = vmul.f32 %v2570_v14, %v2564_v16  ;;  %3264 = vmatpush3.bf16.msra.mxu0 %v2720_v13 }
0x1bbd   :  { %v2573_v60 = vmul.f32 %v2571_v18, %v2565_v17 }
0x1bbf   :  { %v2574_v19 = vpack.c.bf16 %v2573_v60, %v2572_v58 }
0x1bc1   :  { %3258 = vmatmul.mubr.bf16.vlgmr.msra.gmra.mrb[28].mxu1 %v2574_v19 }
0x1c94   :  { %v2615_v1 = vpop.f32.mrb[28].mxu1 }
0x1c95   :  { %v2616_v49 = vadd.f32 %v2897_v20, %v2615_v1  ;;  %v3259_v4 = vpop.f32.mrb[29].mxu1 }
0x1c96   :  { %v2618_v21 = vpop.f32.mrb[30].mxu1  ;;  %v2903_v4 = vld [vmem:[%s4429_s18] ss:$0 sm:$0xff]  ;;  %s3603_s18 = scalar_lea.vmem %s2780_s4, 256 }
0x1c97   :  { %v2619_v22 = vadd.f32 %v2897_v20, %v2618_v21  ;;  %v3260_v5 = vpop.f32.mrb[31].mxu1  ;;  %v2622_v23 = vadd.f32 %v2616_v49, %v2511_v41  ;;  %p3604_p0 = scmp.ne.s32.totalorder %s2780_s4, %s3603_s18  ;;  %p3609_p2 = scmp.lt.s32.totalorder %s3603_s18, %s3603_s18 }
0x1c99   :  { %v2628_v24 = vsel %vm321_vm5, %v2622_v23, 0.0  ;;  %v2623_v25 = vadd.f32 %v2619_v22, %v4305_v42  ;;  %p3610_p3 = por %p3609_p2, %p3608_p1 }
0x1c9a   :  { %2629 = vadd.xlane.f32.xlu1 %v2628_v24  ;;  %v2904_v24 = vld [vmem:[%s4431_s20] ss:$0 sm:$0xff] }
0x1c9b   :  { %v2631_v27 = vsel %vm321_vm5, %v2623_v25, 0.0  ;;  %p3611_p4 = pnand %p3610_p3, %p3604_p0 }
0x1c9c   :  { %2632 = vadd.xlane.f32.xlu0 %v2631_v27 }
0x1d27   :  { %v2630_v28 = vpop.xlane.xlu1 %2629 }
0x1d28   :  { %v2634_v47 = vmul.f32 0.03125, %v2630_v28 }
0x1d29   :  { %v2633_v59 = vpop.xlane.xlu0 %2632 }
0x1d2a   :  { %v2636_v29 = vsub.f32 %v2622_v23, %v2634_v47  ;;  %v2635_v56 = vmul.f32 0.03125, %v2633_v59 }
0x1d2c   :  { %v2637_v30 = vsub.f32 %v2623_v25, %v2635_v56  ;;  %v2638_v31 = vmul.f32 %v2636_v29, %v2636_v29 }
0x1d2e   :  { %v2640_v32 = vsel %vm321_vm5, %v2638_v31, 0.0  ;;  %v2639_v44 = vmul.f32 %v2637_v30, %v2637_v30 }
0x1d2f   :  { %2641 = vadd.xlane.f32.xlu1 %v2640_v32 }
0x1d30   :  { %v2643_v33 = vsel %vm321_vm5, %v2639_v44, 0.0 }
0x1d31   :  { %2644 = vadd.xlane.f32.xlu0 %v2643_v33 }
0x1dbc   :  { %v2642_v36 = vpop.xlane.xlu1 %2641 }
0x1dbd   :  { %v2646_v37 = vmul.f32 0.03125, %v2642_v36 }
0x1dbe   :  { %v2645_v38 = vpop.xlane.xlu0 %2644 }
0x1dbf   :  { %v2648_v41 = vadd.f32 1e-05, %v2646_v37  ;;  %v2647_v42 = vmul.f32 0.03125, %v2645_v38 }
0x1dc1   :  { %3593 = vrsqrt.f32 %v2648_v41  ;;  %v2649_v3 = vadd.f32 1e-05, %v2647_v42 }
0x1dc3   :  { %3595 = vrsqrt.f32 %v2649_v3 }
0x1dcb   :  { %v3594_v43 = vpop.eup %3593 }
0x1dcc   :  { %v2652_v45 = vmul.f32 %v3594_v43, %v2636_v29 }
0x1dcd   :  { %v3596_v46 = vpop.eup %3595 }
0x1dce   :  { %v2660_v50 = vmul.f32 %v2900_v0, %v2652_v45  ;;  %v2653_v34 = vmul.f32 %v3596_v46, %v2637_v30 }
0x1dd0   :  { %v2668_v35 = vadd.f32 %v2901_v48, %v2660_v50  ;;  %v2661_v54 = vmul.f32 %v2900_v0, %v2653_v34 }
0x1dd2   :  { %v2672_v55 = vsel %vm321_vm5, %v2668_v35, 0.0  ;;  %v2669_v57 = vadd.f32 %v2901_v48, %v2661_v54 }
0x1dd3   :  { %2673 = vadd.xlane.f32.xlu1 %v2672_v55 }
0x1dd4   :  { %v2675_v61 = vsel %vm321_vm5, %v2669_v57, 0.0 }
0x1dd5   :  { %2676 = vadd.xlane.f32.xlu0 %v2675_v61 }
0x1e60   :  { %v2674_v62 = vpop.xlane.xlu1 %2673 }
0x1e61   :  { %v2678_v51 = vmul.f32 0.03125, %v2674_v62 }
0x1e62   :  { %v2677_v52 = vpop.xlane.xlu0 %2676 }
0x1e63   :  { %v2680_v63 = vsub.f32 %v2668_v35, %v2678_v51  ;;  %v2679_v2 = vmul.f32 0.03125, %v2677_v52 }
0x1e65   :  { %v2681_v6 = vsub.f32 %v2669_v57, %v2679_v2  ;;  %v2682_v7 = vmul.f32 %v2680_v63, %v2680_v63 }
0x1e67   :  { %v2684_v40 = vsel %vm321_vm5, %v2682_v7, 0.0  ;;  %v2683_v39 = vmul.f32 %v2681_v6, %v2681_v6 }
0x1e68   :  { %2685 = vadd.xlane.f32.xlu1 %v2684_v40 }
0x1e69   :  { %v2687_v8 = vsel %vm321_vm5, %v2683_v39, 0.0 }
0x1e6a   :  { %2688 = vadd.xlane.f32.xlu0 %v2687_v8 }
0x1ef5   :  { %v2686_v14 = vpop.xlane.xlu1 %2685 }
0x1ef6   :  { %v2690_v15 = vmul.f32 0.03125, %v2686_v14 }
0x1ef7   :  { %v2689_v16 = vpop.xlane.xlu0 %2688 }
0x1ef8   :  { %v2692_v17 = vadd.f32 1e-05, %v2690_v15  ;;  %v2691_v18 = vmul.f32 0.03125, %v2689_v16 }
0x1efa   :  { %3597 = vrsqrt.f32 %v2692_v17  ;;  %v2693_v58 = vadd.f32 1e-05, %v2691_v18 }
0x1efc   :  { %3599 = vrsqrt.f32 %v2693_v58 }
0x1f04   :  { %v3598_v60 = vpop.eup %3597 }
0x1f05   :  { %v2696_v19 = vmul.f32 %v3598_v60, %v2680_v63 }
0x1f06   :  { %v3600_v20 = vpop.eup %3599 }
0x1f07   :  { %v2704_v1 = vmul.f32 %v2902_v26, %v2696_v19  ;;  %v2697_v49 = vmul.f32 %v3600_v20, %v2681_v6 }
0x1f09   :  { %v2705_v21 = vmul.f32 %v2902_v26, %v2697_v49  ;;  %v2712_v22 = vadd.f32 %v2903_v4, %v2704_v1 }
0x1f0b   :  { %v2713_v5 = vadd.f32 %v2903_v4, %v2705_v21 }
0x1f0d   :  { %v2714_v23 = vpack.c.bf16 %v2713_v5, %v2712_v22 }
0x1f0f   :  { %3266 = vmatmul.mubr.msk.bf16.vlgmr.msra.gmra.mrb[36].mxu0 %vm321_vm5, %v2714_v23 }
0x1fe2   :  { %v2765_v25 = vpop.f32.mrb[36].mxu0 }
0x1fe3   :  { %v2766_v27 = vadd.f32 %v2904_v24, %v2765_v25  ;;  %v3267_v28 = vpop.f32.mrb[37].mxu0 }
0x1fe4   :  { %v2768_v47 = vpop.f32.mrb[38].mxu0 }
0x1fe5   :  { %2772 = vst.msk [vmem:[#allocation2] sm:$0xff] %vm184_vm1, %v2766_v27  ;;  %v2769_v59 = vadd.f32 %v2904_v24, %v2768_v47  ;;  %v3268_v29 = vpop.f32.mrb[39].mxu0 }
0x1fe7   :  { %2773 = vst.msk [vmem:[#allocation2 + $0x8] sm:$0xff] %vm184_vm1, %v2769_v59 }
0x1fe8   :  { %3614 = shalt.err (!%p3611_p4)
}
0x1fe9   :  { %s3615_s28 = scalar_lea.hbm %s4432_s21, 256 }
0x1fea   :  { %p3616_p5 = scmp.ne.s32.totalorder %s4432_s21, %s3615_s28  ;;  %p3619_p6 = scmp.lt.u32.totalorder %s3615_s28, %s4432_s21 }
0x1fec   :  { %p3621_p7 = pnand %p3619_p6, %p3616_p5 }
0x1fee   :  { %3624 = shalt.err (!%p3621_p7)
}
0x1fef   :  { %s3645_s13 = smov 128  }
0x1ff0   :  { %2785 = dma.vmem_to_hbm [thread:$0]  %s2780_s4, 256, %s4432_s21, [#allocation3], %s3645_s13, %s3645_s13, %s4477_s22  }
0x1ff1   :  { %3625 = dma.done.wait [#allocation3], 256  }
0x1ff2   :  { %3626 = vsyncadd [#allocation3], 4294967040 }
0x1ff3   :  { %2789 = vsyncpa [#allocation3], 1 }

</bundles_post_ra>
